<compile_context>
chip_gen: v7x
topology: tpu7x:2x2x1
jax: 0.10.0
libtpu: 0.0.40
codegen_flags: <defaults>
</compile_context>

<pallas_src>
import jax
import jax.numpy as jnp
from jax.experimental import pallas as pl
from jax.experimental.pallas import tpu as pltpu

# ---- hyper-parameters mirroring TemporalDiscounting.__init__ -----------------
T = 8                 # number of experiment steps
B = 8                 # batch size (must be a multiple of B_TILE)
B_TILE = 8            # per-grid-step batch chunk (sublane multiple)
H = 32                # design-net hidden width
DESIGN_SHAPE = 2      # (reward_short_delay, delay) per design
SHIFT = 0.0
EPSILON = 0.01
LONG_REWARD = 100.0
# short_delay buffer == 0.0  -> pv_ss constant-folds to reward_short
# discount_type = "hyperbolic"

OUT_W = 128           # lane-dense packed output width (2*T + T = 24 used cols)

_ERF_C1 = 1.1283791671  # 2/sqrt(pi)
_ERF_C3 = 0.1009130992  # cubic coeff of the tanh erf approximation


def _erf_tanh(x):
    # erf(x) ~= tanh(2/sqrt(pi)*x + c3*x^3)  (GELU-style approx, |err| ~ 1e-3)
    # Single native EUP tanh instead of exp + recip + Horner on the carried path.
    return jnp.tanh(x * (_ERF_C1 + _ERF_C3 * x * x))


def rollout_kernel(scal_ref, wmat_ref, wh_ref, out_ref):
    # scal_ref : (B_TILE, 2+T) f32 -> col0 = log_k, col1 = alpha, cols 2.. = uniforms
    # wmat_ref : (8, H)       f32 -> rows: wed0, wed1, wey, be, bh, wo_col0, wo_col1, bo(pad)
    # wh_ref   : (H, H)       bf16-> emitter hidden weights (MXU operand)
    # out_ref  : (B_TILE, OUT_W) f32 -> cols [0, 2T) designs (t-major), [2T, 3T) outcomes
    scal = scal_ref[...]
    wmat = wmat_ref[...]
    wh = wh_ref[...]                                       # bf16

    BT = B_TILE

    # ---- loop-invariant values (hoisted once) --------------------------------
    log_k = scal[:, 0:1]                                   # (BT, 1)
    alpha = scal[:, 1:2]                                   # (BT, 1)
    k = jnp.exp(log_k)
    inv_alpha = pl.reciprocal(jnp.abs(alpha) + 0.001, approx=True)

    # explicit hoisted broadcasts (JAX does not CSE broadcast_in_dim per iter)
    wed0 = jnp.broadcast_to(wmat[0:1, :], (BT, H))         # encode design[:,0]
    wed1 = jnp.broadcast_to(wmat[1:2, :], (BT, H))         # encode design[:,1]
    wey = jnp.broadcast_to(wmat[2:3, :], (BT, H))          # encode outcome
    be = jnp.broadcast_to(wmat[3:4, :], (BT, H))           # encoder bias
    bh = jnp.broadcast_to(wmat[4:5, :], (BT, H))           # emitter hidden bias
    wo0 = jnp.broadcast_to(wmat[5:6, :], (BT, H))          # emitter out col 0
    wo1 = jnp.broadcast_to(wmat[6:7, :], (BT, H))          # emitter out col 1
    bo0 = jnp.broadcast_to(wmat[7:8, 0:1], (BT, 1))        # emitter out bias 0
    bo1 = jnp.broadcast_to(wmat[7:8, 1:2], (BT, 1))        # emitter out bias 1

    pooled = jnp.zeros((BT, H), jnp.float32)               # pooled history (value carry)

    design_cols = []
    outcome_cols = []

    for t in range(T):                                     # static unrolled rollout
        # ---- design_net: pooled encoder + MLP emitter -------------------------
        hidden = jnp.maximum(
            jnp.dot(pooled.astype(jnp.bfloat16), wh,
                    preferred_element_type=jnp.float32) + bh, 0.0)              # (BT, H) MXU
        # N=2 emitter matmul -> two XLU lane-reductions (no MXU round-trip)
        d0 = jnp.sum(hidden * wo0, axis=-1, keepdims=True) + bo0                # (BT, 1)
        d1 = jnp.sum(hidden * wo1, axis=-1, keepdims=True) + bo1                # (BT, 1)

        # ---- outcome_likelihood (hyperbolic discounting + erf choice model) ---
        delay = jnp.exp(d1 - SHIFT)
        reward_short = LONG_REWARD * (0.5 * (1.0 + jnp.tanh(0.5 * d0)))          # sigmoid via tanh
        pv_ll = LONG_REWARD * pl.reciprocal(1.0 + k * delay, approx=True)
        pv_ss = reward_short                               # short_delay == 0 folded
        diff = pv_ll - pv_ss
        p = EPSILON + (1.0 - 2.0 * EPSILON) * (0.5 + 0.5 * _erf_tanh(diff * inv_alpha))

        # Bernoulli sample: compare pre-drawn uniform against p
        u = scal[:, 2 + t:3 + t]                           # (BT, 1)
        outcome = (u < p).astype(jnp.float32)

        design_cols.append(d0)
        design_cols.append(d1)
        outcome_cols.append(outcome)

        # ---- fold the new (design, outcome) datapoint into the pooled state ---
        # K=2 encoder matmul -> VPU broadcast FMAs
        enc = jnp.maximum(d0 * wed0 + d1 * wed1 + outcome * wey + be, 0.0)       # (BT, H)
        pooled = pooled + enc

    # single unmasked lane-dense store (one HBM writeback, no masked vst.msk)
    pad = jnp.zeros((BT, OUT_W - 3 * T), jnp.float32)
    out_ref[...] = jnp.concatenate(design_cols + outcome_cols + [pad], axis=-1)


def pack_design_net_params(params):
    """One-time packing of design-net params (hoisted out of the per-call path)."""
    wed, wey, be, wh, bh, wo, bo = params
    bo_row = jnp.zeros((1, H), jnp.float32).at[0, :DESIGN_SHAPE].set(bo.reshape(-1))
    wmat = jnp.concatenate([wed, wey, be, bh, wo.T, bo_row], axis=0).astype(jnp.float32)
    wh_bf16 = wh.astype(jnp.bfloat16)
    return wmat, wh_bf16


@jax.jit
def temporal_discounting_rollout(log_k, alpha, u, wmat, wh_bf16):
    """Runs the T-step rollout.  Returns ((log_k, alpha), designs, outcomes)."""
    assert B % B_TILE == 0
    # pack per-batch scalars + per-step uniforms into one (B, 2+T) block
    scal = jnp.concatenate(
        [log_k.reshape(B, 1), alpha.reshape(B, 1), u.reshape(T, B).T],
        axis=-1).astype(jnp.float32)

    packed = pl.pallas_call(
        rollout_kernel,
        out_shape=jax.ShapeDtypeStruct((B, OUT_W), jnp.float32),
        grid=(B // B_TILE,),
        in_specs=[
            pl.BlockSpec((B_TILE, 2 + T), lambda i: (i, 0)),
            pl.BlockSpec((8, H), lambda i: (0, 0)),
            pl.BlockSpec((H, H), lambda i: (0, 0)),
        ],
        out_specs=pl.BlockSpec((B_TILE, OUT_W), lambda i: (i, 0)),
        compiler_params=pltpu.CompilerParams(
            dimension_semantics=("parallel",)),   # shards batch chunks across v7x TCs
    )(scal, wmat, wh_bf16)

    designs = packed[:, :T * DESIGN_SHAPE].reshape(B, T, DESIGN_SHAPE).transpose(1, 0, 2)
    outcomes = packed[:, T * DESIGN_SHAPE:T * DESIGN_SHAPE + T].T[:, :, None]
    return (log_k, alpha), designs, outcomes


def init_design_net_params(key):
    """Deterministic synthetic design-net weights (design_shape = 2)."""
    k1, k2, k3, k4 = jax.random.split(key, 4)
    wed = 0.1 * jax.random.normal(k1, (DESIGN_SHAPE, H), jnp.float32)   # encode design
    wey = 0.1 * jax.random.normal(k2, (1, H), jnp.float32)              # encode outcome
    be = jnp.zeros((1, H), jnp.float32)
    wh = 0.1 * jax.random.normal(k3, (H, H), jnp.float32)
    bh = jnp.zeros((1, H), jnp.float32)
    wo = 0.1 * jax.random.normal(k4, (H, DESIGN_SHAPE), jnp.float32)
    bo = jnp.array([[0.0, 1.0]], jnp.float32)                           # bias delay > 0
    return (wed, wey, be, wh, bh, wo, bo)


if __name__ == "__main__":
    key = jax.random.PRNGKey(0)
    k_params, k_logk, k_alpha, k_u = jax.random.split(key, 4)

    params = init_design_net_params(k_params)
    wmat, wh_bf16 = pack_design_net_params(params)   # one-time params packing

    # prior_log_k ~ Normal(-4.25, 1.5), prior_alpha ~ HalfNormal(2) (synthetic priors)
    # TODO(synk): torch.distributions prior sampling + Bernoulli RNG are host-side;
    # we draw them with jax.random (uniforms for Bernoulli are fed to the kernel).
    log_k = -4.25 + 1.5 * jax.random.normal(k_logk, (B,), jnp.float32)
    alpha = jnp.abs(2.0 * jax.random.normal(k_alpha, (B,), jnp.float32)) + 0.1
    u = jax.random.uniform(k_u, (T, B, 1), jnp.float32)

    (lk, al), designs, outcomes = temporal_discounting_rollout(log_k, alpha, u, wmat, wh_bf16)
    jax.block_until_ready((designs, outcomes))

    assert designs.shape == (T, B, DESIGN_SHAPE)
    assert outcomes.shape == (T, B, 1)
    assert bool(jnp.all(jnp.isfinite(designs)))
    assert bool(jnp.all((outcomes == 0.0) | (outcomes == 1.0)))
    print("KERNEL_OK")
</pallas_src>

<mosaic_0001>
module attributes {stable_mosaic.version = 11 : i64} {
  func.func @rollout_kernel(%arg0: i32, %arg1: memref<8x10xf32, #tpu.memory_space<vmem>>, %arg2: memref<8x32xf32, #tpu.memory_space<vmem>>, %arg3: memref<32x32xbf16, #tpu.memory_space<vmem>>, %arg4: memref<8x128xf32, #tpu.memory_space<vmem>>) attributes {dimension_semantics = [#tpu.dimension_semantics<parallel>], iteration_bounds = array<i64: 1>, scalar_prefetch = 0 : i64, scratch_operands = 0 : i64, tpu.core_type = #tpu.core_type<tc>, window_params = [{transform_indices = @transform_0, window_bounds = array<i64: 8, 10>}, {pipeline_mode = #tpu.pipeline_mode<synchronous>, transform_indices = @transform_1, window_bounds = array<i64: 8, 32>}, {pipeline_mode = #tpu.pipeline_mode<synchronous>, transform_indices = @transform_2, window_bounds = array<i64: 32, 32>}, {transform_indices = @transform_3, window_bounds = array<i64: 8, 128>}]} {
    %c0 = arith.constant 0 : index
    %c0_0 = arith.constant 0 : index
    %0 = vector.load %arg1[%c0, %c0_0] : memref<8x10xf32, #tpu.memory_space<vmem>>, vector<8x10xf32>
    %c0_1 = arith.constant 0 : index
    %c0_2 = arith.constant 0 : index
    %1 = vector.load %arg2[%c0_1, %c0_2] : memref<8x32xf32, #tpu.memory_space<vmem>>, vector<8x32xf32>
    %c0_3 = arith.constant 0 : index
    %c0_4 = arith.constant 0 : index
    %2 = vector.load %arg3[%c0_3, %c0_4] : memref<32x32xbf16, #tpu.memory_space<vmem>>, vector<32x32xbf16>
    %3 = vector.extract_strided_slice %0 {offsets = [0, 0], sizes = [8, 1], strides = [1, 1]} : vector<8x10xf32> to vector<8x1xf32>
    %4 = vector.extract_strided_slice %0 {offsets = [0, 1], sizes = [8, 1], strides = [1, 1]} : vector<8x10xf32> to vector<8x1xf32>
    %5 = math.exp %3 : vector<8x1xf32>
    %6 = math.absf %4 : vector<8x1xf32>
    %cst = arith.constant 1.000000e-03 : f32
    %7 = vector.broadcast %cst : f32 to vector<8x1xf32>
    %8 = arith.addf %6, %7 : vector<8x1xf32>
    %9 = tpu.reciprocal %8 {approx = true} : vector<8x1xf32> -> vector<8x1xf32>
    %10 = vector.extract_strided_slice %1 {offsets = [0, 0], sizes = [1, 32], strides = [1, 1]} : vector<8x32xf32> to vector<1x32xf32>
    %11 = vector.shape_cast %10 : vector<1x32xf32> to vector<1x32xf32>
    %12 = vector.broadcast %11 : vector<1x32xf32> to vector<8x32xf32>
    %13 = vector.extract_strided_slice %1 {offsets = [1, 0], sizes = [1, 32], strides = [1, 1]} : vector<8x32xf32> to vector<1x32xf32>
    %14 = vector.shape_cast %13 : vector<1x32xf32> to vector<1x32xf32>
    %15 = vector.broadcast %14 : vector<1x32xf32> to vector<8x32xf32>
    %16 = vector.extract_strided_slice %1 {offsets = [2, 0], sizes = [1, 32], strides = [1, 1]} : vector<8x32xf32> to vector<1x32xf32>
    %17 = vector.shape_cast %16 : vector<1x32xf32> to vector<1x32xf32>
    %18 = vector.broadcast %17 : vector<1x32xf32> to vector<8x32xf32>
    %19 = vector.extract_strided_slice %1 {offsets = [3, 0], sizes = [1, 32], strides = [1, 1]} : vector<8x32xf32> to vector<1x32xf32>
    %20 = vector.shape_cast %19 : vector<1x32xf32> to vector<1x32xf32>
    %21 = vector.broadcast %20 : vector<1x32xf32> to vector<8x32xf32>
    %22 = vector.extract_strided_slice %1 {offsets = [4, 0], sizes = [1, 32], strides = [1, 1]} : vector<8x32xf32> to vector<1x32xf32>
    %23 = vector.shape_cast %22 : vector<1x32xf32> to vector<1x32xf32>
    %24 = vector.broadcast %23 : vector<1x32xf32> to vector<8x32xf32>
    %25 = vector.extract_strided_slice %1 {offsets = [5, 0], sizes = [1, 32], strides = [1, 1]} : vector<8x32xf32> to vector<1x32xf32>
    %26 = vector.shape_cast %25 : vector<1x32xf32> to vector<1x32xf32>
    %27 = vector.broadcast %26 : vector<1x32xf32> to vector<8x32xf32>
    %28 = vector.extract_strided_slice %1 {offsets = [6, 0], sizes = [1, 32], strides = [1, 1]} : vector<8x32xf32> to vector<1x32xf32>
    %29 = vector.shape_cast %28 : vector<1x32xf32> to vector<1x32xf32>
    %30 = vector.broadcast %29 : vector<1x32xf32> to vector<8x32xf32>
    %31 = vector.extract_strided_slice %1 {offsets = [7, 0], sizes = [1, 1], strides = [1, 1]} : vector<8x32xf32> to vector<1x1xf32>
    %32 = vector.shape_cast %31 : vector<1x1xf32> to vector<1x1xf32>
    %33 = vector.broadcast %32 : vector<1x1xf32> to vector<8x1xf32>
    %34 = vector.extract_strided_slice %1 {offsets = [7, 1], sizes = [1, 1], strides = [1, 1]} : vector<8x32xf32> to vector<1x1xf32>
    %35 = vector.shape_cast %34 : vector<1x1xf32> to vector<1x1xf32>
    %36 = vector.broadcast %35 : vector<1x1xf32> to vector<8x1xf32>
    %cst_5 = arith.constant 0.000000e+00 : f32
    %37 = vector.broadcast %cst_5 : f32 to vector<8x32xf32>
    %38 = arith.truncf %37 : vector<8x32xf32> to vector<8x32xbf16>
    %cst_6 = arith.constant dense<0.000000e+00> : vector<8x32xf32>
    %39 = tpu.matmul %38, %2, %cst_6 {dimension_numbers = #tpu.dot_dimension_numbers<[1], [0], [0], [1], [0, 0, 1, 1], [], []>} : vector<8x32xbf16>, vector<32x32xbf16>, vector<8x32xf32> -> vector<8x32xf32>
    %40 = arith.addf %39, %24 : vector<8x32xf32>
    %cst_7 = arith.constant 0.000000e+00 : f32
    %41 = vector.broadcast %cst_7 : f32 to vector<8x32xf32>
    %42 = arith.maximumf %40, %41 : vector<8x32xf32>
    %43 = arith.mulf %42, %27 : vector<8x32xf32>
    %cst_8 = arith.constant dense<0.000000e+00> : vector<8xf32>
    %44 = vector.multi_reduction <add>, %43, %cst_8 [1] : vector<8x32xf32> to vector<8xf32>
    %45 = vector.shape_cast %44 : vector<8xf32> to vector<8x1xf32>
    %46 = arith.addf %45, %33 : vector<8x1xf32>
    %47 = arith.mulf %42, %30 : vector<8x32xf32>
    %cst_9 = arith.constant dense<0.000000e+00> : vector<8xf32>
    %48 = vector.multi_reduction <add>, %47, %cst_9 [1] : vector<8x32xf32> to vector<8xf32>
    %49 = vector.shape_cast %48 : vector<8xf32> to vector<8x1xf32>
    %50 = arith.addf %49, %36 : vector<8x1xf32>
    %cst_10 = arith.constant 0.000000e+00 : f32
    %51 = vector.broadcast %cst_10 : f32 to vector<8x1xf32>
    %52 = arith.subf %50, %51 : vector<8x1xf32>
    %53 = math.exp %52 : vector<8x1xf32>
    %cst_11 = arith.constant 5.000000e-01 : f32
    %54 = vector.broadcast %cst_11 : f32 to vector<8x1xf32>
    %55 = arith.mulf %54, %46 : vector<8x1xf32>
    %56 = math.tanh %55 : vector<8x1xf32>
    %cst_12 = arith.constant 1.000000e+00 : f32
    %57 = vector.broadcast %cst_12 : f32 to vector<8x1xf32>
    %58 = arith.addf %57, %56 : vector<8x1xf32>
    %cst_13 = arith.constant 5.000000e-01 : f32
    %59 = vector.broadcast %cst_13 : f32 to vector<8x1xf32>
    %60 = arith.mulf %59, %58 : vector<8x1xf32>
    %cst_14 = arith.constant 1.000000e+02 : f32
    %61 = vector.broadcast %cst_14 : f32 to vector<8x1xf32>
    %62 = arith.mulf %61, %60 : vector<8x1xf32>
    %63 = arith.mulf %5, %53 : vector<8x1xf32>
    %cst_15 = arith.constant 1.000000e+00 : f32
    %64 = vector.broadcast %cst_15 : f32 to vector<8x1xf32>
    %65 = arith.addf %64, %63 : vector<8x1xf32>
    %66 = tpu.reciprocal %65 {approx = true} : vector<8x1xf32> -> vector<8x1xf32>
    %cst_16 = arith.constant 1.000000e+02 : f32
    %67 = vector.broadcast %cst_16 : f32 to vector<8x1xf32>
    %68 = arith.mulf %67, %66 : vector<8x1xf32>
    %69 = arith.subf %68, %62 : vector<8x1xf32>
    %70 = arith.mulf %69, %9 : vector<8x1xf32>
    %cst_17 = arith.constant 0.1009131 : f32
    %71 = vector.broadcast %cst_17 : f32 to vector<8x1xf32>
    %72 = arith.mulf %71, %70 : vector<8x1xf32>
    %73 = arith.mulf %72, %70 : vector<8x1xf32>
    %cst_18 = arith.constant 1.12837923 : f32
    %74 = vector.broadcast %cst_18 : f32 to vector<8x1xf32>
    %75 = arith.addf %74, %73 : vector<8x1xf32>
    %76 = arith.mulf %70, %75 : vector<8x1xf32>
    %77 = math.tanh %76 : vector<8x1xf32>
    %cst_19 = arith.constant 5.000000e-01 : f32
    %78 = vector.broadcast %cst_19 : f32 to vector<8x1xf32>
    %79 = arith.mulf %78, %77 : vector<8x1xf32>
    %cst_20 = arith.constant 5.000000e-01 : f32
    %80 = vector.broadcast %cst_20 : f32 to vector<8x1xf32>
    %81 = arith.addf %80, %79 : vector<8x1xf32>
    %cst_21 = arith.constant 9.800000e-01 : f32
    %82 = vector.broadcast %cst_21 : f32 to vector<8x1xf32>
    %83 = arith.mulf %82, %81 : vector<8x1xf32>
    %cst_22 = arith.constant 0.00999999977 : f32
    %84 = vector.broadcast %cst_22 : f32 to vector<8x1xf32>
    %85 = arith.addf %84, %83 : vector<8x1xf32>
    %86 = vector.extract_strided_slice %0 {offsets = [0, 2], sizes = [8, 1], strides = [1, 1]} : vector<8x10xf32> to vector<8x1xf32>
    %87 = arith.cmpf olt, %86, %85 : vector<8x1xf32>
    %88 = arith.extui %87 : vector<8x1xi1> to vector<8x1xi32>
    %89 = arith.sitofp %88 : vector<8x1xi32> to vector<8x1xf32>
    %90 = vector.broadcast %46 : vector<8x1xf32> to vector<8x32xf32>
    %91 = arith.mulf %90, %12 : vector<8x32xf32>
    %92 = vector.broadcast %50 : vector<8x1xf32> to vector<8x32xf32>
    %93 = arith.mulf %92, %15 : vector<8x32xf32>
    %94 = arith.addf %91, %93 : vector<8x32xf32>
    %95 = vector.broadcast %89 : vector<8x1xf32> to vector<8x32xf32>
    %96 = arith.mulf %95, %18 : vector<8x32xf32>
    %97 = arith.addf %94, %96 : vector<8x32xf32>
    %98 = arith.addf %97, %21 : vector<8x32xf32>
    %cst_23 = arith.constant 0.000000e+00 : f32
    %99 = vector.broadcast %cst_23 : f32 to vector<8x32xf32>
    %100 = arith.maximumf %98, %99 : vector<8x32xf32>
    %101 = arith.addf %37, %100 : vector<8x32xf32>
    %102 = arith.truncf %101 : vector<8x32xf32> to vector<8x32xbf16>
    %cst_24 = arith.constant dense<0.000000e+00> : vector<8x32xf32>
    %103 = tpu.matmul %102, %2, %cst_24 {dimension_numbers = #tpu.dot_dimension_numbers<[1], [0], [0], [1], [0, 0, 1, 1], [], []>} : vector<8x32xbf16>, vector<32x32xbf16>, vector<8x32xf32> -> vector<8x32xf32>
    %104 = arith.addf %103, %24 : vector<8x32xf32>
    %cst_25 = arith.constant 0.000000e+00 : f32
    %105 = vector.broadcast %cst_25 : f32 to vector<8x32xf32>
    %106 = arith.maximumf %104, %105 : vector<8x32xf32>
    %107 = arith.mulf %106, %27 : vector<8x32xf32>
    %cst_26 = arith.constant dense<0.000000e+00> : vector<8xf32>
    %108 = vector.multi_reduction <add>, %107, %cst_26 [1] : vector<8x32xf32> to vector<8xf32>
    %109 = vector.shape_cast %108 : vector<8xf32> to vector<8x1xf32>
    %110 = arith.addf %109, %33 : vector<8x1xf32>
    %111 = arith.mulf %106, %30 : vector<8x32xf32>
    %cst_27 = arith.constant dense<0.000000e+00> : vector<8xf32>
    %112 = vector.multi_reduction <add>, %111, %cst_27 [1] : vector<8x32xf32> to vector<8xf32>
    %113 = vector.shape_cast %112 : vector<8xf32> to vector<8x1xf32>
    %114 = arith.addf %113, %36 : vector<8x1xf32>
    %cst_28 = arith.constant 0.000000e+00 : f32
    %115 = vector.broadcast %cst_28 : f32 to vector<8x1xf32>
    %116 = arith.subf %114, %115 : vector<8x1xf32>
    %117 = math.exp %116 : vector<8x1xf32>
    %cst_29 = arith.constant 5.000000e-01 : f32
    %118 = vector.broadcast %cst_29 : f32 to vector<8x1xf32>
    %119 = arith.mulf %118, %110 : vector<8x1xf32>
    %120 = math.tanh %119 : vector<8x1xf32>
    %cst_30 = arith.constant 1.000000e+00 : f32
    %121 = vector.broadcast %cst_30 : f32 to vector<8x1xf32>
    %122 = arith.addf %121, %120 : vector<8x1xf32>
    %cst_31 = arith.constant 5.000000e-01 : f32
    %123 = vector.broadcast %cst_31 : f32 to vector<8x1xf32>
    %124 = arith.mulf %123, %122 : vector<8x1xf32>
    %cst_32 = arith.constant 1.000000e+02 : f32
    %125 = vector.broadcast %cst_32 : f32 to vector<8x1xf32>
    %126 = arith.mulf %125, %124 : vector<8x1xf32>
    %127 = arith.mulf %5, %117 : vector<8x1xf32>
    %cst_33 = arith.constant 1.000000e+00 : f32
    %128 = vector.broadcast %cst_33 : f32 to vector<8x1xf32>
    %129 = arith.addf %128, %127 : vector<8x1xf32>
    %130 = tpu.reciprocal %129 {approx = true} : vector<8x1xf32> -> vector<8x1xf32>
    %cst_34 = arith.constant 1.000000e+02 : f32
    %131 = vector.broadcast %cst_34 : f32 to vector<8x1xf32>
    %132 = arith.mulf %131, %130 : vector<8x1xf32>
    %133 = arith.subf %132, %126 : vector<8x1xf32>
    %134 = arith.mulf %133, %9 : vector<8x1xf32>
    %cst_35 = arith.constant 0.1009131 : f32
    %135 = vector.broadcast %cst_35 : f32 to vector<8x1xf32>
    %136 = arith.mulf %135, %134 : vector<8x1xf32>
    %137 = arith.mulf %136, %134 : vector<8x1xf32>
    %cst_36 = arith.constant 1.12837923 : f32
    %138 = vector.broadcast %cst_36 : f32 to vector<8x1xf32>
    %139 = arith.addf %138, %137 : vector<8x1xf32>
    %140 = arith.mulf %134, %139 : vector<8x1xf32>
    %141 = math.tanh %140 : vector<8x1xf32>
    %cst_37 = arith.constant 5.000000e-01 : f32
    %142 = vector.broadcast %cst_37 : f32 to vector<8x1xf32>
    %143 = arith.mulf %142, %141 : vector<8x1xf32>
    %cst_38 = arith.constant 5.000000e-01 : f32
    %144 = vector.broadcast %cst_38 : f32 to vector<8x1xf32>
    %145 = arith.addf %144, %143 : vector<8x1xf32>
    %cst_39 = arith.constant 9.800000e-01 : f32
    %146 = vector.broadcast %cst_39 : f32 to vector<8x1xf32>
    %147 = arith.mulf %146, %145 : vector<8x1xf32>
    %cst_40 = arith.constant 0.00999999977 : f32
    %148 = vector.broadcast %cst_40 : f32 to vector<8x1xf32>
    %149 = arith.addf %148, %147 : vector<8x1xf32>
    %150 = vector.extract_strided_slice %0 {offsets = [0, 3], sizes = [8, 1], strides = [1, 1]} : vector<8x10xf32> to vector<8x1xf32>
    %151 = arith.cmpf olt, %150, %149 : vector<8x1xf32>
    %152 = arith.extui %151 : vector<8x1xi1> to vector<8x1xi32>
    %153 = arith.sitofp %152 : vector<8x1xi32> to vector<8x1xf32>
    %154 = vector.broadcast %110 : vector<8x1xf32> to vector<8x32xf32>
    %155 = arith.mulf %154, %12 : vector<8x32xf32>
    %156 = vector.broadcast %114 : vector<8x1xf32> to vector<8x32xf32>
    %157 = arith.mulf %156, %15 : vector<8x32xf32>
    %158 = arith.addf %155, %157 : vector<8x32xf32>
    %159 = vector.broadcast %153 : vector<8x1xf32> to vector<8x32xf32>
    %160 = arith.mulf %159, %18 : vector<8x32xf32>
    %161 = arith.addf %158, %160 : vector<8x32xf32>
    %162 = arith.addf %161, %21 : vector<8x32xf32>
    %cst_41 = arith.constant 0.000000e+00 : f32
    %163 = vector.broadcast %cst_41 : f32 to vector<8x32xf32>
    %164 = arith.maximumf %162, %163 : vector<8x32xf32>
    %165 = arith.addf %101, %164 : vector<8x32xf32>
    %166 = arith.truncf %165 : vector<8x32xf32> to vector<8x32xbf16>
    %cst_42 = arith.constant dense<0.000000e+00> : vector<8x32xf32>
    %167 = tpu.matmul %166, %2, %cst_42 {dimension_numbers = #tpu.dot_dimension_numbers<[1], [0], [0], [1], [0, 0, 1, 1], [], []>} : vector<8x32xbf16>, vector<32x32xbf16>, vector<8x32xf32> -> vector<8x32xf32>
    %168 = arith.addf %167, %24 : vector<8x32xf32>
    %cst_43 = arith.constant 0.000000e+00 : f32
    %169 = vector.broadcast %cst_43 : f32 to vector<8x32xf32>
    %170 = arith.maximumf %168, %169 : vector<8x32xf32>
    %171 = arith.mulf %170, %27 : vector<8x32xf32>
    %cst_44 = arith.constant dense<0.000000e+00> : vector<8xf32>
    %172 = vector.multi_reduction <add>, %171, %cst_44 [1] : vector<8x32xf32> to vector<8xf32>
    %173 = vector.shape_cast %172 : vector<8xf32> to vector<8x1xf32>
    %174 = arith.addf %173, %33 : vector<8x1xf32>
    %175 = arith.mulf %170, %30 : vector<8x32xf32>
    %cst_45 = arith.constant dense<0.000000e+00> : vector<8xf32>
    %176 = vector.multi_reduction <add>, %175, %cst_45 [1] : vector<8x32xf32> to vector<8xf32>
    %177 = vector.shape_cast %176 : vector<8xf32> to vector<8x1xf32>
    %178 = arith.addf %177, %36 : vector<8x1xf32>
    %cst_46 = arith.constant 0.000000e+00 : f32
    %179 = vector.broadcast %cst_46 : f32 to vector<8x1xf32>
    %180 = arith.subf %178, %179 : vector<8x1xf32>
    %181 = math.exp %180 : vector<8x1xf32>
    %cst_47 = arith.constant 5.000000e-01 : f32
    %182 = vector.broadcast %cst_47 : f32 to vector<8x1xf32>
    %183 = arith.mulf %182, %174 : vector<8x1xf32>
    %184 = math.tanh %183 : vector<8x1xf32>
    %cst_48 = arith.constant 1.000000e+00 : f32
    %185 = vector.broadcast %cst_48 : f32 to vector<8x1xf32>
    %186 = arith.addf %185, %184 : vector<8x1xf32>
    %cst_49 = arith.constant 5.000000e-01 : f32
    %187 = vector.broadcast %cst_49 : f32 to vector<8x1xf32>
    %188 = arith.mulf %187, %186 : vector<8x1xf32>
    %cst_50 = arith.constant 1.000000e+02 : f32
    %189 = vector.broadcast %cst_50 : f32 to vector<8x1xf32>
    %190 = arith.mulf %189, %188 : vector<8x1xf32>
    %191 = arith.mulf %5, %181 : vector<8x1xf32>
    %cst_51 = arith.constant 1.000000e+00 : f32
    %192 = vector.broadcast %cst_51 : f32 to vector<8x1xf32>
    %193 = arith.addf %192, %191 : vector<8x1xf32>
    %194 = tpu.reciprocal %193 {approx = true} : vector<8x1xf32> -> vector<8x1xf32>
    %cst_52 = arith.constant 1.000000e+02 : f32
    %195 = vector.broadcast %cst_52 : f32 to vector<8x1xf32>
    %196 = arith.mulf %195, %194 : vector<8x1xf32>
    %197 = arith.subf %196, %190 : vector<8x1xf32>
    %198 = arith.mulf %197, %9 : vector<8x1xf32>
    %cst_53 = arith.constant 0.1009131 : f32
    %199 = vector.broadcast %cst_53 : f32 to vector<8x1xf32>
    %200 = arith.mulf %199, %198 : vector<8x1xf32>
    %201 = arith.mulf %200, %198 : vector<8x1xf32>
    %cst_54 = arith.constant 1.12837923 : f32
    %202 = vector.broadcast %cst_54 : f32 to vector<8x1xf32>
    %203 = arith.addf %202, %201 : vector<8x1xf32>
    %204 = arith.mulf %198, %203 : vector<8x1xf32>
    %205 = math.tanh %204 : vector<8x1xf32>
    %cst_55 = arith.constant 5.000000e-01 : f32
    %206 = vector.broadcast %cst_55 : f32 to vector<8x1xf32>
    %207 = arith.mulf %206, %205 : vector<8x1xf32>
    %cst_56 = arith.constant 5.000000e-01 : f32
    %208 = vector.broadcast %cst_56 : f32 to vector<8x1xf32>
    %209 = arith.addf %208, %207 : vector<8x1xf32>
    %cst_57 = arith.constant 9.800000e-01 : f32
    %210 = vector.broadcast %cst_57 : f32 to vector<8x1xf32>
    %211 = arith.mulf %210, %209 : vector<8x1xf32>
    %cst_58 = arith.constant 0.00999999977 : f32
    %212 = vector.broadcast %cst_58 : f32 to vector<8x1xf32>
    %213 = arith.addf %212, %211 : vector<8x1xf32>
    %214 = vector.extract_strided_slice %0 {offsets = [0, 4], sizes = [8, 1], strides = [1, 1]} : vector<8x10xf32> to vector<8x1xf32>
    %215 = arith.cmpf olt, %214, %213 : vector<8x1xf32>
    %216 = arith.extui %215 : vector<8x1xi1> to vector<8x1xi32>
    %217 = arith.sitofp %216 : vector<8x1xi32> to vector<8x1xf32>
    %218 = vector.broadcast %174 : vector<8x1xf32> to vector<8x32xf32>
    %219 = arith.mulf %218, %12 : vector<8x32xf32>
    %220 = vector.broadcast %178 : vector<8x1xf32> to vector<8x32xf32>
    %221 = arith.mulf %220, %15 : vector<8x32xf32>
    %222 = arith.addf %219, %221 : vector<8x32xf32>
    %223 = vector.broadcast %217 : vector<8x1xf32> to vector<8x32xf32>
    %224 = arith.mulf %223, %18 : vector<8x32xf32>
    %225 = arith.addf %222, %224 : vector<8x32xf32>
    %226 = arith.addf %225, %21 : vector<8x32xf32>
    %cst_59 = arith.constant 0.000000e+00 : f32
    %227 = vector.broadcast %cst_59 : f32 to vector<8x32xf32>
    %228 = arith.maximumf %226, %227 : vector<8x32xf32>
    %229 = arith.addf %165, %228 : vector<8x32xf32>
    %230 = arith.truncf %229 : vector<8x32xf32> to vector<8x32xbf16>
    %cst_60 = arith.constant dense<0.000000e+00> : vector<8x32xf32>
    %231 = tpu.matmul %230, %2, %cst_60 {dimension_numbers = #tpu.dot_dimension_numbers<[1], [0], [0], [1], [0, 0, 1, 1], [], []>} : vector<8x32xbf16>, vector<32x32xbf16>, vector<8x32xf32> -> vector<8x32xf32>
    %232 = arith.addf %231, %24 : vector<8x32xf32>
    %cst_61 = arith.constant 0.000000e+00 : f32
    %233 = vector.broadcast %cst_61 : f32 to vector<8x32xf32>
    %234 = arith.maximumf %232, %233 : vector<8x32xf32>
    %235 = arith.mulf %234, %27 : vector<8x32xf32>
    %cst_62 = arith.constant dense<0.000000e+00> : vector<8xf32>
    %236 = vector.multi_reduction <add>, %235, %cst_62 [1] : vector<8x32xf32> to vector<8xf32>
    %237 = vector.shape_cast %236 : vector<8xf32> to vector<8x1xf32>
    %238 = arith.addf %237, %33 : vector<8x1xf32>
    %239 = arith.mulf %234, %30 : vector<8x32xf32>
    %cst_63 = arith.constant dense<0.000000e+00> : vector<8xf32>
    %240 = vector.multi_reduction <add>, %239, %cst_63 [1] : vector<8x32xf32> to vector<8xf32>
    %241 = vector.shape_cast %240 : vector<8xf32> to vector<8x1xf32>
    %242 = arith.addf %241, %36 : vector<8x1xf32>
    %cst_64 = arith.constant 0.000000e+00 : f32
    %243 = vector.broadcast %cst_64 : f32 to vector<8x1xf32>
    %244 = arith.subf %242, %243 : vector<8x1xf32>
    %245 = math.exp %244 : vector<8x1xf32>
    %cst_65 = arith.constant 5.000000e-01 : f32
    %246 = vector.broadcast %cst_65 : f32 to vector<8x1xf32>
    %247 = arith.mulf %246, %238 : vector<8x1xf32>
    %248 = math.tanh %247 : vector<8x1xf32>
    %cst_66 = arith.constant 1.000000e+00 : f32
    %249 = vector.broadcast %cst_66 : f32 to vector<8x1xf32>
    %250 = arith.addf %249, %248 : vector<8x1xf32>
    %cst_67 = arith.constant 5.000000e-01 : f32
    %251 = vector.broadcast %cst_67 : f32 to vector<8x1xf32>
    %252 = arith.mulf %251, %250 : vector<8x1xf32>
    %cst_68 = arith.constant 1.000000e+02 : f32
    %253 = vector.broadcast %cst_68 : f32 to vector<8x1xf32>
    %254 = arith.mulf %253, %252 : vector<8x1xf32>
    %255 = arith.mulf %5, %245 : vector<8x1xf32>
    %cst_69 = arith.constant 1.000000e+00 : f32
    %256 = vector.broadcast %cst_69 : f32 to vector<8x1xf32>
    %257 = arith.addf %256, %255 : vector<8x1xf32>
    %258 = tpu.reciprocal %257 {approx = true} : vector<8x1xf32> -> vector<8x1xf32>
    %cst_70 = arith.constant 1.000000e+02 : f32
    %259 = vector.broadcast %cst_70 : f32 to vector<8x1xf32>
    %260 = arith.mulf %259, %258 : vector<8x1xf32>
    %261 = arith.subf %260, %254 : vector<8x1xf32>
    %262 = arith.mulf %261, %9 : vector<8x1xf32>
    %cst_71 = arith.constant 0.1009131 : f32
    %263 = vector.broadcast %cst_71 : f32 to vector<8x1xf32>
    %264 = arith.mulf %263, %262 : vector<8x1xf32>
    %265 = arith.mulf %264, %262 : vector<8x1xf32>
    %cst_72 = arith.constant 1.12837923 : f32
    %266 = vector.broadcast %cst_72 : f32 to vector<8x1xf32>
    %267 = arith.addf %266, %265 : vector<8x1xf32>
    %268 = arith.mulf %262, %267 : vector<8x1xf32>
    %269 = math.tanh %268 : vector<8x1xf32>
    %cst_73 = arith.constant 5.000000e-01 : f32
    %270 = vector.broadcast %cst_73 : f32 to vector<8x1xf32>
    %271 = arith.mulf %270, %269 : vector<8x1xf32>
    %cst_74 = arith.constant 5.000000e-01 : f32
    %272 = vector.broadcast %cst_74 : f32 to vector<8x1xf32>
    %273 = arith.addf %272, %271 : vector<8x1xf32>
    %cst_75 = arith.constant 9.800000e-01 : f32
    %274 = vector.broadcast %cst_75 : f32 to vector<8x1xf32>
    %275 = arith.mulf %274, %273 : vector<8x1xf32>
    %cst_76 = arith.constant 0.00999999977 : f32
    %276 = vector.broadcast %cst_76 : f32 to vector<8x1xf32>
    %277 = arith.addf %276, %275 : vector<8x1xf32>
    %278 = vector.extract_strided_slice %0 {offsets = [0, 5], sizes = [8, 1], strides = [1, 1]} : vector<8x10xf32> to vector<8x1xf32>
    %279 = arith.cmpf olt, %278, %277 : vector<8x1xf32>
    %280 = arith.extui %279 : vector<8x1xi1> to vector<8x1xi32>
    %281 = arith.sitofp %280 : vector<8x1xi32> to vector<8x1xf32>
    %282 = vector.broadcast %238 : vector<8x1xf32> to vector<8x32xf32>
    %283 = arith.mulf %282, %12 : vector<8x32xf32>
    %284 = vector.broadcast %242 : vector<8x1xf32> to vector<8x32xf32>
    %285 = arith.mulf %284, %15 : vector<8x32xf32>
    %286 = arith.addf %283, %285 : vector<8x32xf32>
    %287 = vector.broadcast %281 : vector<8x1xf32> to vector<8x32xf32>
    %288 = arith.mulf %287, %18 : vector<8x32xf32>
    %289 = arith.addf %286, %288 : vector<8x32xf32>
    %290 = arith.addf %289, %21 : vector<8x32xf32>
    %cst_77 = arith.constant 0.000000e+00 : f32
    %291 = vector.broadcast %cst_77 : f32 to vector<8x32xf32>
    %292 = arith.maximumf %290, %291 : vector<8x32xf32>
    %293 = arith.addf %229, %292 : vector<8x32xf32>
    %294 = arith.truncf %293 : vector<8x32xf32> to vector<8x32xbf16>
    %cst_78 = arith.constant dense<0.000000e+00> : vector<8x32xf32>
    %295 = tpu.matmul %294, %2, %cst_78 {dimension_numbers = #tpu.dot_dimension_numbers<[1], [0], [0], [1], [0, 0, 1, 1], [], []>} : vector<8x32xbf16>, vector<32x32xbf16>, vector<8x32xf32> -> vector<8x32xf32>
    %296 = arith.addf %295, %24 : vector<8x32xf32>
    %cst_79 = arith.constant 0.000000e+00 : f32
    %297 = vector.broadcast %cst_79 : f32 to vector<8x32xf32>
    %298 = arith.maximumf %296, %297 : vector<8x32xf32>
    %299 = arith.mulf %298, %27 : vector<8x32xf32>
    %cst_80 = arith.constant dense<0.000000e+00> : vector<8xf32>
    %300 = vector.multi_reduction <add>, %299, %cst_80 [1] : vector<8x32xf32> to vector<8xf32>
    %301 = vector.shape_cast %300 : vector<8xf32> to vector<8x1xf32>
    %302 = arith.addf %301, %33 : vector<8x1xf32>
    %303 = arith.mulf %298, %30 : vector<8x32xf32>
    %cst_81 = arith.constant dense<0.000000e+00> : vector<8xf32>
    %304 = vector.multi_reduction <add>, %303, %cst_81 [1] : vector<8x32xf32> to vector<8xf32>
    %305 = vector.shape_cast %304 : vector<8xf32> to vector<8x1xf32>
    %306 = arith.addf %305, %36 : vector<8x1xf32>
    %cst_82 = arith.constant 0.000000e+00 : f32
    %307 = vector.broadcast %cst_82 : f32 to vector<8x1xf32>
    %308 = arith.subf %306, %307 : vector<8x1xf32>
    %309 = math.exp %308 : vector<8x1xf32>
    %cst_83 = arith.constant 5.000000e-01 : f32
    %310 = vector.broadcast %cst_83 : f32 to vector<8x1xf32>
    %311 = arith.mulf %310, %302 : vector<8x1xf32>
    %312 = math.tanh %311 : vector<8x1xf32>
    %cst_84 = arith.constant 1.000000e+00 : f32
    %313 = vector.broadcast %cst_84 : f32 to vector<8x1xf32>
    %314 = arith.addf %313, %312 : vector<8x1xf32>
    %cst_85 = arith.constant 5.000000e-01 : f32
    %315 = vector.broadcast %cst_85 : f32 to vector<8x1xf32>
    %316 = arith.mulf %315, %314 : vector<8x1xf32>
    %cst_86 = arith.constant 1.000000e+02 : f32
    %317 = vector.broadcast %cst_86 : f32 to vector<8x1xf32>
    %318 = arith.mulf %317, %316 : vector<8x1xf32>
    %319 = arith.mulf %5, %309 : vector<8x1xf32>
    %cst_87 = arith.constant 1.000000e+00 : f32
    %320 = vector.broadcast %cst_87 : f32 to vector<8x1xf32>
    %321 = arith.addf %320, %319 : vector<8x1xf32>
    %322 = tpu.reciprocal %321 {approx = true} : vector<8x1xf32> -> vector<8x1xf32>
    %cst_88 = arith.constant 1.000000e+02 : f32
    %323 = vector.broadcast %cst_88 : f32 to vector<8x1xf32>
    %324 = arith.mulf %323, %322 : vector<8x1xf32>
    %325 = arith.subf %324, %318 : vector<8x1xf32>
    %326 = arith.mulf %325, %9 : vector<8x1xf32>
    %cst_89 = arith.constant 0.1009131 : f32
    %327 = vector.broadcast %cst_89 : f32 to vector<8x1xf32>
    %328 = arith.mulf %327, %326 : vector<8x1xf32>
    %329 = arith.mulf %328, %326 : vector<8x1xf32>
    %cst_90 = arith.constant 1.12837923 : f32
    %330 = vector.broadcast %cst_90 : f32 to vector<8x1xf32>
    %331 = arith.addf %330, %329 : vector<8x1xf32>
    %332 = arith.mulf %326, %331 : vector<8x1xf32>
    %333 = math.tanh %332 : vector<8x1xf32>
    %cst_91 = arith.constant 5.000000e-01 : f32
    %334 = vector.broadcast %cst_91 : f32 to vector<8x1xf32>
    %335 = arith.mulf %334, %333 : vector<8x1xf32>
    %cst_92 = arith.constant 5.000000e-01 : f32
    %336 = vector.broadcast %cst_92 : f32 to vector<8x1xf32>
    %337 = arith.addf %336, %335 : vector<8x1xf32>
    %cst_93 = arith.constant 9.800000e-01 : f32
    %338 = vector.broadcast %cst_93 : f32 to vector<8x1xf32>
    %339 = arith.mulf %338, %337 : vector<8x1xf32>
    %cst_94 = arith.constant 0.00999999977 : f32
    %340 = vector.broadcast %cst_94 : f32 to vector<8x1xf32>
    %341 = arith.addf %340, %339 : vector<8x1xf32>
    %342 = vector.extract_strided_slice %0 {offsets = [0, 6], sizes = [8, 1], strides = [1, 1]} : vector<8x10xf32> to vector<8x1xf32>
    %343 = arith.cmpf olt, %342, %341 : vector<8x1xf32>
    %344 = arith.extui %343 : vector<8x1xi1> to vector<8x1xi32>
    %345 = arith.sitofp %344 : vector<8x1xi32> to vector<8x1xf32>
    %346 = vector.broadcast %302 : vector<8x1xf32> to vector<8x32xf32>
    %347 = arith.mulf %346, %12 : vector<8x32xf32>
    %348 = vector.broadcast %306 : vector<8x1xf32> to vector<8x32xf32>
    %349 = arith.mulf %348, %15 : vector<8x32xf32>
    %350 = arith.addf %347, %349 : vector<8x32xf32>
    %351 = vector.broadcast %345 : vector<8x1xf32> to vector<8x32xf32>
    %352 = arith.mulf %351, %18 : vector<8x32xf32>
    %353 = arith.addf %350, %352 : vector<8x32xf32>
    %354 = arith.addf %353, %21 : vector<8x32xf32>
    %cst_95 = arith.constant 0.000000e+00 : f32
    %355 = vector.broadcast %cst_95 : f32 to vector<8x32xf32>
    %356 = arith.maximumf %354, %355 : vector<8x32xf32>
    %357 = arith.addf %293, %356 : vector<8x32xf32>
    %358 = arith.truncf %357 : vector<8x32xf32> to vector<8x32xbf16>
    %cst_96 = arith.constant dense<0.000000e+00> : vector<8x32xf32>
    %359 = tpu.matmul %358, %2, %cst_96 {dimension_numbers = #tpu.dot_dimension_numbers<[1], [0], [0], [1], [0, 0, 1, 1], [], []>} : vector<8x32xbf16>, vector<32x32xbf16>, vector<8x32xf32> -> vector<8x32xf32>
    %360 = arith.addf %359, %24 : vector<8x32xf32>
    %cst_97 = arith.constant 0.000000e+00 : f32
    %361 = vector.broadcast %cst_97 : f32 to vector<8x32xf32>
    %362 = arith.maximumf %360, %361 : vector<8x32xf32>
    %363 = arith.mulf %362, %27 : vector<8x32xf32>
    %cst_98 = arith.constant dense<0.000000e+00> : vector<8xf32>
    %364 = vector.multi_reduction <add>, %363, %cst_98 [1] : vector<8x32xf32> to vector<8xf32>
    %365 = vector.shape_cast %364 : vector<8xf32> to vector<8x1xf32>
    %366 = arith.addf %365, %33 : vector<8x1xf32>
    %367 = arith.mulf %362, %30 : vector<8x32xf32>
    %cst_99 = arith.constant dense<0.000000e+00> : vector<8xf32>
    %368 = vector.multi_reduction <add>, %367, %cst_99 [1] : vector<8x32xf32> to vector<8xf32>
    %369 = vector.shape_cast %368 : vector<8xf32> to vector<8x1xf32>
    %370 = arith.addf %369, %36 : vector<8x1xf32>
    %cst_100 = arith.constant 0.000000e+00 : f32
    %371 = vector.broadcast %cst_100 : f32 to vector<8x1xf32>
    %372 = arith.subf %370, %371 : vector<8x1xf32>
    %373 = math.exp %372 : vector<8x1xf32>
    %cst_101 = arith.constant 5.000000e-01 : f32
    %374 = vector.broadcast %cst_101 : f32 to vector<8x1xf32>
    %375 = arith.mulf %374, %366 : vector<8x1xf32>
    %376 = math.tanh %375 : vector<8x1xf32>
    %cst_102 = arith.constant 1.000000e+00 : f32
    %377 = vector.broadcast %cst_102 : f32 to vector<8x1xf32>
    %378 = arith.addf %377, %376 : vector<8x1xf32>
    %cst_103 = arith.constant 5.000000e-01 : f32
    %379 = vector.broadcast %cst_103 : f32 to vector<8x1xf32>
    %380 = arith.mulf %379, %378 : vector<8x1xf32>
    %cst_104 = arith.constant 1.000000e+02 : f32
    %381 = vector.broadcast %cst_104 : f32 to vector<8x1xf32>
    %382 = arith.mulf %381, %380 : vector<8x1xf32>
    %383 = arith.mulf %5, %373 : vector<8x1xf32>
    %cst_105 = arith.constant 1.000000e+00 : f32
    %384 = vector.broadcast %cst_105 : f32 to vector<8x1xf32>
    %385 = arith.addf %384, %383 : vector<8x1xf32>
    %386 = tpu.reciprocal %385 {approx = true} : vector<8x1xf32> -> vector<8x1xf32>
    %cst_106 = arith.constant 1.000000e+02 : f32
    %387 = vector.broadcast %cst_106 : f32 to vector<8x1xf32>
    %388 = arith.mulf %387, %386 : vector<8x1xf32>
    %389 = arith.subf %388, %382 : vector<8x1xf32>
    %390 = arith.mulf %389, %9 : vector<8x1xf32>
    %cst_107 = arith.constant 0.1009131 : f32
    %391 = vector.broadcast %cst_107 : f32 to vector<8x1xf32>
    %392 = arith.mulf %391, %390 : vector<8x1xf32>
    %393 = arith.mulf %392, %390 : vector<8x1xf32>
    %cst_108 = arith.constant 1.12837923 : f32
    %394 = vector.broadcast %cst_108 : f32 to vector<8x1xf32>
    %395 = arith.addf %394, %393 : vector<8x1xf32>
    %396 = arith.mulf %390, %395 : vector<8x1xf32>
    %397 = math.tanh %396 : vector<8x1xf32>
    %cst_109 = arith.constant 5.000000e-01 : f32
    %398 = vector.broadcast %cst_109 : f32 to vector<8x1xf32>
    %399 = arith.mulf %398, %397 : vector<8x1xf32>
    %cst_110 = arith.constant 5.000000e-01 : f32
    %400 = vector.broadcast %cst_110 : f32 to vector<8x1xf32>
    %401 = arith.addf %400, %399 : vector<8x1xf32>
    %cst_111 = arith.constant 9.800000e-01 : f32
    %402 = vector.broadcast %cst_111 : f32 to vector<8x1xf32>
    %403 = arith.mulf %402, %401 : vector<8x1xf32>
    %cst_112 = arith.constant 0.00999999977 : f32
    %404 = vector.broadcast %cst_112 : f32 to vector<8x1xf32>
    %405 = arith.addf %404, %403 : vector<8x1xf32>
    %406 = vector.extract_strided_slice %0 {offsets = [0, 7], sizes = [8, 1], strides = [1, 1]} : vector<8x10xf32> to vector<8x1xf32>
    %407 = arith.cmpf olt, %406, %405 : vector<8x1xf32>
    %408 = arith.extui %407 : vector<8x1xi1> to vector<8x1xi32>
    %409 = arith.sitofp %408 : vector<8x1xi32> to vector<8x1xf32>
    %410 = vector.broadcast %366 : vector<8x1xf32> to vector<8x32xf32>
    %411 = arith.mulf %410, %12 : vector<8x32xf32>
    %412 = vector.broadcast %370 : vector<8x1xf32> to vector<8x32xf32>
    %413 = arith.mulf %412, %15 : vector<8x32xf32>
    %414 = arith.addf %411, %413 : vector<8x32xf32>
    %415 = vector.broadcast %409 : vector<8x1xf32> to vector<8x32xf32>
    %416 = arith.mulf %415, %18 : vector<8x32xf32>
    %417 = arith.addf %414, %416 : vector<8x32xf32>
    %418 = arith.addf %417, %21 : vector<8x32xf32>
    %cst_113 = arith.constant 0.000000e+00 : f32
    %419 = vector.broadcast %cst_113 : f32 to vector<8x32xf32>
    %420 = arith.maximumf %418, %419 : vector<8x32xf32>
    %421 = arith.addf %357, %420 : vector<8x32xf32>
    %422 = arith.truncf %421 : vector<8x32xf32> to vector<8x32xbf16>
    %cst_114 = arith.constant dense<0.000000e+00> : vector<8x32xf32>
    %423 = tpu.matmul %422, %2, %cst_114 {dimension_numbers = #tpu.dot_dimension_numbers<[1], [0], [0], [1], [0, 0, 1, 1], [], []>} : vector<8x32xbf16>, vector<32x32xbf16>, vector<8x32xf32> -> vector<8x32xf32>
    %424 = arith.addf %423, %24 : vector<8x32xf32>
    %cst_115 = arith.constant 0.000000e+00 : f32
    %425 = vector.broadcast %cst_115 : f32 to vector<8x32xf32>
    %426 = arith.maximumf %424, %425 : vector<8x32xf32>
    %427 = arith.mulf %426, %27 : vector<8x32xf32>
    %cst_116 = arith.constant dense<0.000000e+00> : vector<8xf32>
    %428 = vector.multi_reduction <add>, %427, %cst_116 [1] : vector<8x32xf32> to vector<8xf32>
    %429 = vector.shape_cast %428 : vector<8xf32> to vector<8x1xf32>
    %430 = arith.addf %429, %33 : vector<8x1xf32>
    %431 = arith.mulf %426, %30 : vector<8x32xf32>
    %cst_117 = arith.constant dense<0.000000e+00> : vector<8xf32>
    %432 = vector.multi_reduction <add>, %431, %cst_117 [1] : vector<8x32xf32> to vector<8xf32>
    %433 = vector.shape_cast %432 : vector<8xf32> to vector<8x1xf32>
    %434 = arith.addf %433, %36 : vector<8x1xf32>
    %cst_118 = arith.constant 0.000000e+00 : f32
    %435 = vector.broadcast %cst_118 : f32 to vector<8x1xf32>
    %436 = arith.subf %434, %435 : vector<8x1xf32>
    %437 = math.exp %436 : vector<8x1xf32>
    %cst_119 = arith.constant 5.000000e-01 : f32
    %438 = vector.broadcast %cst_119 : f32 to vector<8x1xf32>
    %439 = arith.mulf %438, %430 : vector<8x1xf32>
    %440 = math.tanh %439 : vector<8x1xf32>
    %cst_120 = arith.constant 1.000000e+00 : f32
    %441 = vector.broadcast %cst_120 : f32 to vector<8x1xf32>
    %442 = arith.addf %441, %440 : vector<8x1xf32>
    %cst_121 = arith.constant 5.000000e-01 : f32
    %443 = vector.broadcast %cst_121 : f32 to vector<8x1xf32>
    %444 = arith.mulf %443, %442 : vector<8x1xf32>
    %cst_122 = arith.constant 1.000000e+02 : f32
    %445 = vector.broadcast %cst_122 : f32 to vector<8x1xf32>
    %446 = arith.mulf %445, %444 : vector<8x1xf32>
    %447 = arith.mulf %5, %437 : vector<8x1xf32>
    %cst_123 = arith.constant 1.000000e+00 : f32
    %448 = vector.broadcast %cst_123 : f32 to vector<8x1xf32>
    %449 = arith.addf %448, %447 : vector<8x1xf32>
    %450 = tpu.reciprocal %449 {approx = true} : vector<8x1xf32> -> vector<8x1xf32>
    %cst_124 = arith.constant 1.000000e+02 : f32
    %451 = vector.broadcast %cst_124 : f32 to vector<8x1xf32>
    %452 = arith.mulf %451, %450 : vector<8x1xf32>
    %453 = arith.subf %452, %446 : vector<8x1xf32>
    %454 = arith.mulf %453, %9 : vector<8x1xf32>
    %cst_125 = arith.constant 0.1009131 : f32
    %455 = vector.broadcast %cst_125 : f32 to vector<8x1xf32>
    %456 = arith.mulf %455, %454 : vector<8x1xf32>
    %457 = arith.mulf %456, %454 : vector<8x1xf32>
    %cst_126 = arith.constant 1.12837923 : f32
    %458 = vector.broadcast %cst_126 : f32 to vector<8x1xf32>
    %459 = arith.addf %458, %457 : vector<8x1xf32>
    %460 = arith.mulf %454, %459 : vector<8x1xf32>
    %461 = math.tanh %460 : vector<8x1xf32>
    %cst_127 = arith.constant 5.000000e-01 : f32
    %462 = vector.broadcast %cst_127 : f32 to vector<8x1xf32>
    %463 = arith.mulf %462, %461 : vector<8x1xf32>
    %cst_128 = arith.constant 5.000000e-01 : f32
    %464 = vector.broadcast %cst_128 : f32 to vector<8x1xf32>
    %465 = arith.addf %464, %463 : vector<8x1xf32>
    %cst_129 = arith.constant 9.800000e-01 : f32
    %466 = vector.broadcast %cst_129 : f32 to vector<8x1xf32>
    %467 = arith.mulf %466, %465 : vector<8x1xf32>
    %cst_130 = arith.constant 0.00999999977 : f32
    %468 = vector.broadcast %cst_130 : f32 to vector<8x1xf32>
    %469 = arith.addf %468, %467 : vector<8x1xf32>
    %470 = vector.extract_strided_slice %0 {offsets = [0, 8], sizes = [8, 1], strides = [1, 1]} : vector<8x10xf32> to vector<8x1xf32>
    %471 = arith.cmpf olt, %470, %469 : vector<8x1xf32>
    %472 = arith.extui %471 : vector<8x1xi1> to vector<8x1xi32>
    %473 = arith.sitofp %472 : vector<8x1xi32> to vector<8x1xf32>
    %474 = vector.broadcast %430 : vector<8x1xf32> to vector<8x32xf32>
    %475 = arith.mulf %474, %12 : vector<8x32xf32>
    %476 = vector.broadcast %434 : vector<8x1xf32> to vector<8x32xf32>
    %477 = arith.mulf %476, %15 : vector<8x32xf32>
    %478 = arith.addf %475, %477 : vector<8x32xf32>
    %479 = vector.broadcast %473 : vector<8x1xf32> to vector<8x32xf32>
    %480 = arith.mulf %479, %18 : vector<8x32xf32>
    %481 = arith.addf %478, %480 : vector<8x32xf32>
    %482 = arith.addf %481, %21 : vector<8x32xf32>
    %cst_131 = arith.constant 0.000000e+00 : f32
    %483 = vector.broadcast %cst_131 : f32 to vector<8x32xf32>
    %484 = arith.maximumf %482, %483 : vector<8x32xf32>
    %485 = arith.addf %421, %484 : vector<8x32xf32>
    %486 = arith.truncf %485 : vector<8x32xf32> to vector<8x32xbf16>
    %cst_132 = arith.constant dense<0.000000e+00> : vector<8x32xf32>
    %487 = tpu.matmul %486, %2, %cst_132 {dimension_numbers = #tpu.dot_dimension_numbers<[1], [0], [0], [1], [0, 0, 1, 1], [], []>} : vector<8x32xbf16>, vector<32x32xbf16>, vector<8x32xf32> -> vector<8x32xf32>
    %488 = arith.addf %487, %24 : vector<8x32xf32>
    %cst_133 = arith.constant 0.000000e+00 : f32
    %489 = vector.broadcast %cst_133 : f32 to vector<8x32xf32>
    %490 = arith.maximumf %488, %489 : vector<8x32xf32>
    %491 = arith.mulf %490, %27 : vector<8x32xf32>
    %cst_134 = arith.constant dense<0.000000e+00> : vector<8xf32>
    %492 = vector.multi_reduction <add>, %491, %cst_134 [1] : vector<8x32xf32> to vector<8xf32>
    %493 = vector.shape_cast %492 : vector<8xf32> to vector<8x1xf32>
    %494 = arith.addf %493, %33 : vector<8x1xf32>
    %495 = arith.mulf %490, %30 : vector<8x32xf32>
    %cst_135 = arith.constant dense<0.000000e+00> : vector<8xf32>
    %496 = vector.multi_reduction <add>, %495, %cst_135 [1] : vector<8x32xf32> to vector<8xf32>
    %497 = vector.shape_cast %496 : vector<8xf32> to vector<8x1xf32>
    %498 = arith.addf %497, %36 : vector<8x1xf32>
    %cst_136 = arith.constant 0.000000e+00 : f32
    %499 = vector.broadcast %cst_136 : f32 to vector<8x1xf32>
    %500 = arith.subf %498, %499 : vector<8x1xf32>
    %501 = math.exp %500 : vector<8x1xf32>
    %cst_137 = arith.constant 5.000000e-01 : f32
    %502 = vector.broadcast %cst_137 : f32 to vector<8x1xf32>
    %503 = arith.mulf %502, %494 : vector<8x1xf32>
    %504 = math.tanh %503 : vector<8x1xf32>
    %cst_138 = arith.constant 1.000000e+00 : f32
    %505 = vector.broadcast %cst_138 : f32 to vector<8x1xf32>
    %506 = arith.addf %505, %504 : vector<8x1xf32>
    %cst_139 = arith.constant 5.000000e-01 : f32
    %507 = vector.broadcast %cst_139 : f32 to vector<8x1xf32>
    %508 = arith.mulf %507, %506 : vector<8x1xf32>
    %cst_140 = arith.constant 1.000000e+02 : f32
    %509 = vector.broadcast %cst_140 : f32 to vector<8x1xf32>
    %510 = arith.mulf %509, %508 : vector<8x1xf32>
    %511 = arith.mulf %5, %501 : vector<8x1xf32>
    %cst_141 = arith.constant 1.000000e+00 : f32
    %512 = vector.broadcast %cst_141 : f32 to vector<8x1xf32>
    %513 = arith.addf %512, %511 : vector<8x1xf32>
    %514 = tpu.reciprocal %513 {approx = true} : vector<8x1xf32> -> vector<8x1xf32>
    %cst_142 = arith.constant 1.000000e+02 : f32
    %515 = vector.broadcast %cst_142 : f32 to vector<8x1xf32>
    %516 = arith.mulf %515, %514 : vector<8x1xf32>
    %517 = arith.subf %516, %510 : vector<8x1xf32>
    %518 = arith.mulf %517, %9 : vector<8x1xf32>
    %cst_143 = arith.constant 0.1009131 : f32
    %519 = vector.broadcast %cst_143 : f32 to vector<8x1xf32>
    %520 = arith.mulf %519, %518 : vector<8x1xf32>
    %521 = arith.mulf %520, %518 : vector<8x1xf32>
    %cst_144 = arith.constant 1.12837923 : f32
    %522 = vector.broadcast %cst_144 : f32 to vector<8x1xf32>
    %523 = arith.addf %522, %521 : vector<8x1xf32>
    %524 = arith.mulf %518, %523 : vector<8x1xf32>
    %525 = math.tanh %524 : vector<8x1xf32>
    %cst_145 = arith.constant 5.000000e-01 : f32
    %526 = vector.broadcast %cst_145 : f32 to vector<8x1xf32>
    %527 = arith.mulf %526, %525 : vector<8x1xf32>
    %cst_146 = arith.constant 5.000000e-01 : f32
    %528 = vector.broadcast %cst_146 : f32 to vector<8x1xf32>
    %529 = arith.addf %528, %527 : vector<8x1xf32>
    %cst_147 = arith.constant 9.800000e-01 : f32
    %530 = vector.broadcast %cst_147 : f32 to vector<8x1xf32>
    %531 = arith.mulf %530, %529 : vector<8x1xf32>
    %cst_148 = arith.constant 0.00999999977 : f32
    %532 = vector.broadcast %cst_148 : f32 to vector<8x1xf32>
    %533 = arith.addf %532, %531 : vector<8x1xf32>
    %534 = vector.extract_strided_slice %0 {offsets = [0, 9], sizes = [8, 1], strides = [1, 1]} : vector<8x10xf32> to vector<8x1xf32>
    %535 = arith.cmpf olt, %534, %533 : vector<8x1xf32>
    %536 = arith.extui %535 : vector<8x1xi1> to vector<8x1xi32>
    %537 = arith.sitofp %536 : vector<8x1xi32> to vector<8x1xf32>
    %cst_149 = arith.constant 0.000000e+00 : f32
    %538 = vector.broadcast %cst_149 : f32 to vector<8x104xf32>
    %539 = tpu.concatenate %46, %50, %110, %114, %174, %178, %238, %242, %302, %306, %366, %370, %430, %434, %494, %498 in 1 : vector<8x1xf32>, vector<8x1xf32>, vector<8x1xf32>, vector<8x1xf32>, vector<8x1xf32>, vector<8x1xf32>, vector<8x1xf32>, vector<8x1xf32>, vector<8x1xf32>, vector<8x1xf32>, vector<8x1xf32>, vector<8x1xf32>, vector<8x1xf32>, vector<8x1xf32>, vector<8x1xf32>, vector<8x1xf32> -> vector<8x16xf32>
    %540 = tpu.concatenate %89, %153, %217, %281, %345, %409, %473, %537, %538 in 1 : vector<8x1xf32>, vector<8x1xf32>, vector<8x1xf32>, vector<8x1xf32>, vector<8x1xf32>, vector<8x1xf32>, vector<8x1xf32>, vector<8x1xf32>, vector<8x104xf32> -> vector<8x112xf32>
    %541 = tpu.concatenate %539, %540 in 1 : vector<8x16xf32>, vector<8x112xf32> -> vector<8x128xf32>
    %c0_150 = arith.constant 0 : index
    %c0_151 = arith.constant 0 : index
    %542 = vector.load %arg4[%c0_150, %c0_151] : memref<8x128xf32, #tpu.memory_space<vmem>>, vector<8x128xf32>
    tpu.vector_store %arg4[%c0_150, %c0_151], %541 {strides = array<i32>} : memref<8x128xf32, #tpu.memory_space<vmem>>, vector<8x128xf32>,
    return
  }
  func.func @transform_0(%arg0: i32) -> (i32, i32) {
    %c0_i32 = arith.constant 0 : i32
    %c0_i32_0 = arith.constant 0 : i32
    return %arg0, %c0_i32 : i32, i32
  }
  func.func @transform_1(%arg0: i32) -> (i32, i32) {
    %c0_i32 = arith.constant 0 : i32
    %c0_i32_0 = arith.constant 0 : i32
    %c0_i32_1 = arith.constant 0 : i32
    return %c0_i32, %c0_i32_0 : i32, i32
  }
  func.func @transform_2(%arg0: i32) -> (i32, i32) {
    %c0_i32 = arith.constant 0 : i32
    %c0_i32_0 = arith.constant 0 : i32
    %c0_i32_1 = arith.constant 0 : i32
    return %c0_i32, %c0_i32_0 : i32, i32
  }
  func.func @transform_3(%arg0: i32) -> (i32, i32) {
    %c0_i32 = arith.constant 0 : i32
    %c0_i32_0 = arith.constant 0 : i32
    return %arg0, %c0_i32 : i32, i32
  }
}

</mosaic_0001>

<bundles_post_ra>
// kernel: temporal_discounting_rollout.1
= control target key start
LH: loop header
LB: loop body
LE: loop exit
PB: predicated region body
PF: predicated region fallthrough
CT: control target
= control target key end

     0   :  { %v1298_v0 = vmov 0.0   ;;  %vm1299_vm0 = vmmov 0   ;;  %v1300_v2 = vmov 0   ;;  %v26_v4 = vlaneseq  ;;  %s1301_s18 = smov 127   ;;  %s1304_s19 = smov 2   ;;  %s1755_s2 = inlined_call_operand.vmem [shape: bf16[32,32], index: 2, kind: input, shape index: {}]   ;;  %s1756_s1 = inlined_call_operand.vmem [shape: f32[8,32], index: 1, kind: input, shape index: {}]   ;;  %s1757_s0 = inlined_call_operand.vmem [shape: f32[8,10], index: 0, kind: input, shape index: {}]   ;;  %s1758_s3 = inlined_call_operand.vmem [shape: f32[8,128], index: 3, kind: output, shape index: {}]  }
   0x1   :  { %1098 = vmatprep.subr.bf16.mxu0 %v1298_v0  ;;  %v1347_v1 = vld [vmem:[%s1755_s2] sm:$0xff]   ;;  %1102 = vmatprep.mubr.msk.bf16.mxu0 %vm1299_vm0, %v1298_v0  ;;  %v1357_v3 = vld [vmem:[%s1755_s2 + $0x8] sm:$0xff]   ;;  %vm70_vm1 = vcmask 261120   ;;  %vm983_vm2 = vcmask 7168   ;;  %v1302_v36 = vmov 1   ;;  %v1303_v56 = vmov 2  }
   0x2   :  { %1187 = vset.pattern.permute.xlu1 %v1300_v2  ;;  %1106 = vmatprep.subr.bf16.mxu1 %v1298_v0  ;;  %v1376_v5 = vshrl.u32 %v26_v4, 7  ;;  %v1382_v7 = vld [vmem:[%s1756_s1] sm:$0xff]  ;;  %s1306_s20 = smov 3   ;;  %s1307_s21 = smov 4   ;;  %vm985_vm11 = vcmask 15360   ;;  %vm987_vm12 = vcmask 23552  }
   0x3   :  { %1099 = vmatpush3.bf16.msra.mxu0 %v1347_v1  ;;  %1107 = vmatpush3.bf16.msra.mxu1 %v1347_v1  ;;  %v1404_v24 = vld [vmem:[%s1757_s0] sm:$0xff]  ;;  %s1310_s22 = smov 5   ;;  %s1312_s23 = smov 6   ;;  %vm989_vm13 = vcmask 31744   ;;  %vm991_vm14 = vcmask 39936   ;;  %vm993_vm15 = vcmask 48128  }
   0x4   :  { %1100 = vmatprep.subr.bf16.mxu0 %v1298_v0  ;;  %1108 = vmatprep.subr.bf16.mxu1 %v1298_v0  ;;  %v44_v6 = vsub.s32 4, %v1376_v5  ;;  %v52_v9 = vsub.s32 6, %v1376_v5  ;;  %v48_v10 = vsub.s32 5, %v1376_v5  ;;  %v56_v23 = vsub.s32 7, %v1376_v5  ;;  %s1314_s24 = smov 7   ;;  %s1316_s25 = smov 8  }
   0x5   :  { %1110 = vmatprep.mubr.msk.bf16.mxu1 %vm1299_vm0, %v1298_v0  ;;  %1193 = vset.pattern.permute.xlu0 %v1300_v2  ;;  %v23_v26 = vand.u32 2147483647, %v1404_v24  ;;  %v21_v37 = vmul.f32 1.442695, %v1404_v24  ;;  %s1317_s26 = smov 126   ;;  %s1318_s27 = smov 9  }
   0x6   :  { %v1385_v8 = vrot.slane %v1382_v7, %v44_v6  ;;  %v1391_v14 = vrot.slane %v1382_v7, %v52_v9  ;;  %v1394_v18 = vrot.slane %v1382_v7, %v48_v10  ;;  %v1407_v25 = vrot.slane %v1382_v7, %v56_v23  ;;  %s1319_s28 = smov 10   ;;  %s1320_s29 = smov 12  }
   0x7   :  { %1101 = vmatpush3.bf16.msra.mxu0 %v1357_v3  ;;  %1109 = vmatpush3.bf16.msra.mxu1 %v1357_v3  ;;  %v24_v30 = vadd.f32 0.001, %v23_v26  ;;  %v32_v6 = vsub.s32 1, %v1376_v5  ;;  %v28_v9 = vsub.s32 0, %v1376_v5  ;;  %s1321_s30 = smov 14  }
   0x8   :  { %1114 = vmatprep.subr.bf16.mxu0 %v1298_v0  ;;  %1122 = vmatprep.subr.bf16.mxu1 %v1298_v0 }
   0x9   :  { %v1435_v10 = vrot.slane %v1382_v7, %v32_v6  ;;  %v1305_v6 = vmov 3  }
   0xa   :  { %1103 = vmatmul.mubr.bf16.vlgmr.msra.gmra.mrb[0].mxu0 %v1300_v2 }
   0xb   :  { %1115 = vmatpush3.bf16.msra.mxu0 %v1347_v1  ;;  %1118 = vmatprep.mubr.msk.bf16.mxu0 %vm1299_vm0, %v1298_v0 }
   0xc   :  { %1116 = vmatprep.subr.bf16.mxu0 %v1298_v0 }
   0xf   :  { %1117 = vmatpush3.bf16.msra.mxu0 %v1357_v3 }
  0x10   :  { %1130 = vmatprep.subr.bf16.mxu0 %v1298_v0 }
  0xdd   :  { %v108_v11 = vpop.f32.mrb[0].mxu0 }
  0xde   :  { %v109_v12 = vadd.f32 %v108_v11, %v1385_v8  ;;  %v1104_v13 = vpop.f32.mrb[1].mxu0  ;;  %v36_v11 = vsub.s32 2, %v1376_v5 }
  0xdf   :  { %v111_v15 = vpop.f32.mrb[2].mxu0  ;;  %v1439_v13 = vrot.slane %v1382_v7, %v28_v9 }
  0xe0   :  { %v114_v16 = vmax.f32 %v109_v12, 0.0  ;;  %v1105_v17 = vpop.f32.mrb[3].mxu0 }
  0xe1   :  { %v40_v17 = vsub.s32 3, %v1376_v5 }
  0xe2   :  { %v120_v19 = vmul.f32 %v114_v16, %v1391_v14  ;;  %v115_v21 = vmul.f32 %v114_v16, %v1394_v18  ;;  %v1443_v16 = vrot.slane %v1382_v7, %v36_v11 }
  0xe4   :  { %v121_v20 = vsel %vm70_vm1, %v120_v19, 0.0  ;;  %v116_v22 = vsel %vm70_vm1, %v115_v21, 0.0 }
  0xe5   :  { %122 = vadd.xlane.f32.xlu0 %v121_v20 }
  0xe9   :  { %117 = vadd.xlane.f32.xlu0 %v116_v22  ;;  %v1448_v22 = vrot.slane %v1382_v7, %v40_v17 }
 0x172   :  { %v123_v27 = vpop.xlane.xlu0 %122 }
 0x173   :  { %v124_v28 = vadd.f32 %v123_v27, %v1407_v25 }
 0x175   :  { %v125_v29 = vmul.f32 1.442695, %v124_v28 }
 0x176   :  { %v118_v31 = vpop.xlane.xlu0 %117 }
 0x177   :  { %1229 = vpow2.f32 %v125_v29  ;;  %v119_v32 = vadd.f32 %v118_v31, %v1407_v25 }
 0x178   :  { %1231 = vrcp.f32 %v24_v30 }
 0x179   :  { %v1413_v33 = vsel %vm983_vm2, %v119_v32, %v124_v28  ;;  %1233 = vpow2.f32 %v21_v37  ;;  %v127_v38 = vmul.f32 0.5, %v119_v32 }
 0x17b   :  { %1235 = vtanh.f32 %v127_v38 }
 0x181   :  { %v1230_v34 = vpop.eup %1229 }
 0x182   :  { %133 = vrot.lane.b32.xlu1 %v1230_v34, %s1301_s18  ;;  %v1232_v35 = vpop.eup %1231 }
 0x183   :  { %v1419_v39 = vpop.eup %1233 }
 0x185   :  { %v1236_v43 = vpop.eup %1235 }
 0x186   :  { %142 = vrot.lane.b32.xlu1 %v1232_v35, %s1301_s18  ;;  %v129_v44 = vadd.f32 1.0, %v1236_v43 }
 0x188   :  { %v130_v45 = vmul.f32 0.5, %v129_v44 }
 0x18a   :  { %164 = vperm.xlu1 %1187, %v119_v32   ;;  %v131_v47 = vmul.f32 100.0, %v130_v45 }
 0x18e   :  { %1188 = vset.pattern.permute.xlu1 %v1302_v36 }
 0x18f   :  { %170 = vperm.xlu1 %1188, %v124_v28  }
 0x193   :  { %1189 = vset.pattern.permute.xlu1 %v1303_v56 }
 0x1f4   :  { %v134_v40 = vpop.permute.xlu1 %133 }
 0x1f5   :  { %v136_v41 = vmul.f32 %v1419_v39, %v134_v40 }
 0x1f7   :  { %v137_v42 = vadd.f32 1.0, %v136_v41 }
 0x1f8   :  { %v1422_v50 = vpop.permute.xlu1 %142 }
 0x1f9   :  { %1237 = vrcp.f32 %v137_v42 }
 0x203   :  { %v1238_v46 = vpop.eup %1237 }
 0x204   :  { %v139_v48 = vmul.f32 100.0, %v1238_v46 }
 0x206   :  { %v140_v49 = vsub.f32 %v139_v48, %v131_v47 }
 0x208   :  { %v145_v51 = vmul.f32 %v1422_v50, %v140_v49 }
 0x209   :  { %v165_v4 = vpop.permute.xlu1 %164 }
 0x20a   :  { %v146_v52 = vmul.f32 0.1009131, %v145_v51  ;;  %v167_v19 = vmul.f32 %v165_v4, %v1439_v13 }
 0x20c   :  { %v147_v53 = vmul.f32 %v146_v52, %v145_v51 }
 0x20e   :  { %v148_v54 = vadd.f32 1.1283792, %v147_v53  ;;  %v171_v12 = vpop.permute.xlu1 %170 }
 0x20f   :  { %v173_v15 = vmul.f32 %v171_v12, %v1435_v10 }
 0x210   :  { %v149_v55 = vmul.f32 %v148_v54, %v145_v51 }
 0x211   :  { %v174_v21 = vadd.f32 %v173_v15, %v167_v19 }
 0x212   :  { %1239 = vtanh.f32 %v149_v55 }
 0x21c   :  { %v1240_v57 = vpop.eup %1239 }
 0x21d   :  { %v151_v58 = vmul.f32 0.5, %v1240_v57 }
 0x21f   :  { %v152_v59 = vadd.f32 0.5, %v151_v58 }
 0x221   :  { %v153_v60 = vmul.f32 0.98, %v152_v59 }
 0x223   :  { %v154_v61 = vadd.f32 0.01, %v153_v60 }
 0x225   :  { %156 = vrot.lane.b32.xlu0 %v154_v61, %s1304_s19 }
 0x297   :  { %v157_v62 = vpop.permute.xlu0 %156 }
 0x298   :  { %vm159_vm3 = vcmp.lt.f32.partialorder %v1404_v24, %v157_v62 }
 0x299   :  { %v1428_v63 = vsel %vm159_vm3, 1.0, %v1298_v0  ;;  %vm1001_vm3 = vcmask 80896  }
 0x29a   :  { %177 = vperm.xlu1 %1189, %v1428_v63  }
 0x29e   :  { %1190 = vset.pattern.permute.xlu1 %v1300_v2 }
 0x319   :  { %v178_v20 = vpop.permute.xlu1 %177 }
 0x31a   :  { %v180_v23 = vmul.f32 %v178_v20, %v1443_v16 }
 0x31c   :  { %v181_v26 = vadd.f32 %v180_v23, %v174_v21 }
 0x31e   :  { %v182_v27 = vadd.f32 %v181_v26, %v1448_v22 }
 0x320   :  { %v1452_v28 = vmax.f32 %v182_v27, 0.0 }
 0x322   :  { %v185_v29 = vpack.c.bf16 %v1452_v28, %v1452_v28 }
 0x324   :  { %1111 = vmatmul.mubr.msk.bf16.vlgmr.msra.gmra.mrb[0].mxu1 %vm70_vm1, %v185_v29 }
 0x325   :  { %1123 = vmatpush3.bf16.msra.mxu1 %v1347_v1  ;;  %1126 = vmatprep.mubr.msk.bf16.mxu1 %vm1299_vm0, %v1298_v0 }
 0x326   :  { %1124 = vmatprep.subr.bf16.mxu1 %v1298_v0 }
 0x329   :  { %1125 = vmatpush3.bf16.msra.mxu1 %v1357_v3 }
 0x32a   :  { %1138 = vmatprep.subr.bf16.mxu1 %v1298_v0 }
 0x3f7   :  { %v223_v5 = vpop.f32.mrb[0].mxu1 }
 0x3f8   :  { %v224_v7 = vadd.f32 %v223_v5, %v1385_v8  ;;  %v1112_v30 = vpop.f32.mrb[1].mxu1 }
 0x3f9   :  { %v226_v31 = vpop.f32.mrb[2].mxu1 }
 0x3fa   :  { %v229_v32 = vmax.f32 %v224_v7, 0.0  ;;  %v1113_v34 = vpop.f32.mrb[3].mxu1 }
 0x3fc   :  { %v235_v35 = vmul.f32 %v229_v32, %v1391_v14  ;;  %v230_v37 = vmul.f32 %v229_v32, %v1394_v18 }
 0x3fe   :  { %v236_v38 = vsel %vm70_vm1, %v235_v35, 0.0  ;;  %v231_v40 = vsel %vm70_vm1, %v230_v37, 0.0 }
 0x3ff   :  { %237 = vadd.xlane.f32.xlu1 %v236_v38  ;;  %232 = vadd.xlane.f32.xlu0 %v231_v40 }
 0x48c   :  { %v238_v41 = vpop.xlane.xlu1 %237  ;;  %v233_v45 = vpop.xlane.xlu0 %232 }
 0x48d   :  { %v1469_v42 = vadd.f32 %v238_v41, %v1407_v25  ;;  %v1474_v46 = vadd.f32 %v233_v45, %v1407_v25 }
 0x48f   :  { %v240_v43 = vmul.f32 1.442695, %v1469_v42  ;;  %v242_v47 = vmul.f32 0.5, %v1474_v46 }
 0x491   :  { %1241 = vpow2.f32 %v240_v43 }
 0x492   :  { %1243 = vtanh.f32 %v242_v47 }
 0x49b   :  { %v1242_v44 = vpop.eup %1241 }
 0x49c   :  { %248 = vrot.lane.b32.xlu1 %v1242_v44, %s1301_s18  ;;  %v1244_v52 = vpop.eup %1243 }
 0x49d   :  { %v244_v53 = vadd.f32 1.0, %v1244_v52 }
 0x49f   :  { %v245_v54 = vmul.f32 0.5, %v244_v53 }
 0x4a0   :  { %275 = vperm.xlu1 %1190, %v1474_v46  }
 0x4a1   :  { %v246_v56 = vmul.f32 100.0, %v245_v54 }
 0x4a4   :  { %1191 = vset.pattern.permute.xlu1 %v1302_v36 }
 0x4a5   :  { %281 = vperm.xlu1 %1191, %v1469_v42  }
 0x4a9   :  { %1192 = vset.pattern.permute.xlu1 %v1305_v6 }
 0x50e   :  { %v249_v48 = vpop.permute.xlu1 %248 }
 0x50f   :  { %v251_v49 = vmul.f32 %v1419_v39, %v249_v48 }
 0x511   :  { %v252_v51 = vadd.f32 1.0, %v251_v49 }
 0x513   :  { %1245 = vrcp.f32 %v252_v51 }
 0x51d   :  { %v1246_v55 = vpop.eup %1245 }
 0x51e   :  { %v254_v57 = vmul.f32 100.0, %v1246_v55 }
 0x51f   :  { %v276_v21 = vpop.permute.xlu1 %275 }
 0x520   :  { %v255_v58 = vsub.f32 %v254_v57, %v246_v56  ;;  %v278_v27 = vmul.f32 %v276_v21, %v1439_v13 }
 0x522   :  { %v256_v59 = vmul.f32 %v255_v58, %v1422_v50 }
 0x524   :  { %v257_v60 = vmul.f32 0.1009131, %v256_v59  ;;  %v282_v23 = vpop.permute.xlu1 %281 }
 0x525   :  { %v284_v26 = vmul.f32 %v282_v23, %v1435_v10 }
 0x526   :  { %v258_v61 = vmul.f32 %v257_v60, %v256_v59 }
 0x527   :  { %v285_v5 = vadd.f32 %v284_v26, %v278_v27 }
 0x528   :  { %v259_v62 = vadd.f32 1.1283792, %v258_v61 }
 0x52a   :  { %v260_v4 = vmul.f32 %v259_v62, %v256_v59 }
 0x52c   :  { %1247 = vtanh.f32 %v260_v4 }
 0x536   :  { %v1248_v9 = vpop.eup %1247 }
 0x537   :  { %v262_v11 = vmul.f32 0.5, %v1248_v9 }
 0x539   :  { %v263_v12 = vadd.f32 0.5, %v262_v11 }
 0x53b   :  { %v264_v15 = vmul.f32 0.98, %v263_v12 }
 0x53d   :  { %v265_v17 = vadd.f32 0.01, %v264_v15 }
 0x53f   :  { %267 = vrot.lane.b32.xlu0 %v265_v17, %s1306_s20 }
 0x5b1   :  { %v268_v19 = vpop.permute.xlu0 %267 }
 0x5b2   :  { %vm270_vm4 = vcmp.lt.f32.partialorder %v1404_v24, %v268_v19 }
 0x5b3   :  { %v1484_v20 = vsel %vm270_vm4, 1.0, %v1298_v0  ;;  %vm1003_vm4 = vcmask 89088  }
 0x5b4   :  { %288 = vperm.xlu1 %1192, %v1484_v20  }
 0x5b8   :  { %1194 = vset.pattern.permute.xlu1 %v1302_v36 }
 0x633   :  { %v289_v29 = vpop.permute.xlu1 %288 }
 0x634   :  { %v291_v7 = vmul.f32 %v289_v29, %v1443_v16 }
 0x636   :  { %v292_v30 = vadd.f32 %v291_v7, %v285_v5  ;;  %v1308_v7 = vmov 4  }
 0x638   :  { %v293_v31 = vadd.f32 %v292_v30, %v1448_v22 }
 0x63a   :  { %v294_v32 = vmax.f32 %v293_v31, 0.0 }
 0x63c   :  { %v1493_v34 = vadd.f32 %v294_v32, %v1452_v28 }
 0x63e   :  { %v296_v35 = vpack.c.bf16 %v1493_v34, %v1493_v34 }
 0x640   :  { %1119 = vmatmul.mubr.msk.bf16.vlgmr.msra.gmra.mrb[4].mxu0 %vm70_vm1, %v296_v35 }
 0x641   :  { %1131 = vmatpush3.bf16.msra.mxu0 %v1347_v1  ;;  %1134 = vmatprep.mubr.msk.bf16.mxu0 %vm1299_vm0, %v1298_v0 }
 0x642   :  { %1132 = vmatprep.subr.bf16.mxu0 %v1298_v0 }
 0x645   :  { %1133 = vmatpush3.bf16.msra.mxu0 %v1357_v3 }
 0x646   :  { %1146 = vmatprep.subr.bf16.mxu0 %v1298_v0 }
 0x713   :  { %v334_v37 = vpop.f32.mrb[4].mxu0 }
 0x714   :  { %v335_v28 = vadd.f32 %v334_v37, %v1385_v8  ;;  %v1120_v38 = vpop.f32.mrb[5].mxu0 }
 0x715   :  { %v337_v40 = vpop.f32.mrb[6].mxu0 }
 0x716   :  { %v340_v41 = vmax.f32 %v335_v28, 0.0  ;;  %v1121_v43 = vpop.f32.mrb[7].mxu0 }
 0x718   :  { %v346_v44 = vmul.f32 %v340_v41, %v1391_v14  ;;  %v341_v45 = vmul.f32 %v340_v41, %v1394_v18 }
 0x71a   :  { %v347_v47 = vsel %vm70_vm1, %v346_v44, 0.0  ;;  %v342_v48 = vsel %vm70_vm1, %v341_v45, 0.0 }
 0x71b   :  { %348 = vadd.xlane.f32.xlu0 %v347_v47  ;;  %343 = vadd.xlane.f32.xlu1 %v342_v48 }
 0x7a8   :  { %v349_v49 = vpop.xlane.xlu0 %348  ;;  %v344_v54 = vpop.xlane.xlu1 %343 }
 0x7a9   :  { %v1510_v51 = vadd.f32 %v349_v49, %v1407_v25  ;;  %v1515_v55 = vadd.f32 %v344_v54, %v1407_v25 }
 0x7ab   :  { %v351_v52 = vmul.f32 1.442695, %v1510_v51  ;;  %v353_v56 = vmul.f32 0.5, %v1515_v55 }
 0x7ad   :  { %1249 = vpow2.f32 %v351_v52 }
 0x7ae   :  { %1251 = vtanh.f32 %v353_v56 }
 0x7b7   :  { %v1250_v53 = vpop.eup %1249 }
 0x7b8   :  { %359 = vrot.lane.b32.xlu0 %v1250_v53, %s1301_s18  ;;  %v1252_v60 = vpop.eup %1251 }
 0x7b9   :  { %v355_v61 = vadd.f32 1.0, %v1252_v60 }
 0x7bb   :  { %v356_v62 = vmul.f32 0.5, %v355_v61 }
 0x7bc   :  { %386 = vperm.xlu0 %1193, %v1515_v55  }
 0x7bd   :  { %v357_v6 = vmul.f32 100.0, %v356_v62 }
 0x82a   :  { %v360_v57 = vpop.permute.xlu0 %359 }
 0x82b   :  { %v362_v58 = vmul.f32 %v1419_v39, %v360_v57 }
 0x82d   :  { %v363_v59 = vadd.f32 1.0, %v362_v58 }
 0x82f   :  { %1253 = vrcp.f32 %v363_v59 }
 0x839   :  { %v1254_v4 = vpop.eup %1253 }
 0x83a   :  { %v365_v9 = vmul.f32 100.0, %v1254_v4 }
 0x83b   :  { %v387_v35 = vpop.permute.xlu0 %386 }
 0x83c   :  { %v366_v11 = vsub.f32 %v365_v9, %v357_v6  ;;  %v389_v28 = vmul.f32 %v387_v35, %v1439_v13 }
 0x83e   :  { %v367_v12 = vmul.f32 %v366_v11, %v1422_v50 }
 0x840   :  { %v368_v15 = vmul.f32 0.1009131, %v367_v12 }
 0x842   :  { %v369_v17 = vmul.f32 %v368_v15, %v367_v12 }
 0x844   :  { %v370_v19 = vadd.f32 1.1283792, %v369_v17 }
 0x846   :  { %v371_v21 = vmul.f32 %v370_v19, %v367_v12 }
 0x848   :  { %1255 = vtanh.f32 %v371_v21 }
 0x852   :  { %v1256_v23 = vpop.eup %1255 }
 0x853   :  { %v373_v26 = vmul.f32 0.5, %v1256_v23 }
 0x855   :  { %v374_v27 = vadd.f32 0.5, %v373_v26 }
 0x857   :  { %v375_v29 = vmul.f32 0.98, %v374_v27 }
 0x859   :  { %v376_v5 = vadd.f32 0.01, %v375_v29 }
 0x85b   :  { %378 = vrot.lane.b32.xlu1 %v376_v5, %s1307_s21 }
 0x85f   :  { %392 = vperm.xlu1 %1194, %v1510_v51  }
 0x863   :  { %1195 = vset.pattern.permute.xlu1 %v1308_v7 }
 0x8cd   :  { %v379_v30 = vpop.permute.xlu1 %378 }
 0x8ce   :  { %vm381_vm5 = vcmp.lt.f32.partialorder %v1404_v24, %v379_v30 }
 0x8cf   :  { %v1525_v31 = vsel %vm381_vm5, 1.0, %v1298_v0  ;;  %vm1005_vm5 = vcmask 97280  }
 0x8d0   :  { %399 = vperm.xlu1 %1195, %v1525_v31  }
 0x8d4   :  { %1196 = vset.pattern.permute.xlu1 %v1302_v36 }
 0x8de   :  { %v393_v32 = vpop.permute.xlu1 %392 }
 0x8df   :  { %v395_v37 = vmul.f32 %v393_v32, %v1435_v10 }
 0x8e1   :  { %v396_v40 = vadd.f32 %v395_v37, %v389_v28 }
 0x94f   :  { %v400_v38 = vpop.permute.xlu1 %399 }
 0x950   :  { %v402_v41 = vmul.f32 %v400_v38, %v1443_v16  ;;  %v1309_v38 = vmov 5  }
 0x952   :  { %v403_v43 = vadd.f32 %v402_v41, %v396_v40 }
 0x954   :  { %v404_v44 = vadd.f32 %v403_v43, %v1448_v22 }
 0x956   :  { %v405_v45 = vmax.f32 %v404_v44, 0.0 }
 0x958   :  { %v1534_v47 = vadd.f32 %v405_v45, %v1493_v34 }
 0x95a   :  { %v407_v48 = vpack.c.bf16 %v1534_v47, %v1534_v47 }
 0x95c   :  { %1127 = vmatmul.mubr.msk.bf16.vlgmr.msra.gmra.mrb[4].mxu1 %vm70_vm1, %v407_v48 }
 0x95d   :  { %1139 = vmatpush3.bf16.msra.mxu1 %v1347_v1  ;;  %1142 = vmatprep.mubr.msk.bf16.mxu1 %vm1299_vm0, %v1298_v0 }
 0x95e   :  { %1140 = vmatprep.subr.bf16.mxu1 %v1298_v0 }
 0x961   :  { %1141 = vmatpush3.bf16.msra.mxu1 %v1357_v3 }
 0x962   :  { %1154 = vmatprep.subr.bf16.mxu1 %v1298_v0 }
 0xa2f   :  { %v445_v49 = vpop.f32.mrb[4].mxu1 }
 0xa30   :  { %v446_v34 = vadd.f32 %v445_v49, %v1385_v8  ;;  %v1128_v52 = vpop.f32.mrb[5].mxu1 }
 0xa31   :  { %v448_v53 = vpop.f32.mrb[6].mxu1 }
 0xa32   :  { %v451_v54 = vmax.f32 %v446_v34, 0.0  ;;  %v1129_v56 = vpop.f32.mrb[7].mxu1 }
 0xa34   :  { %v457_v57 = vmul.f32 %v451_v54, %v1391_v14  ;;  %v452_v58 = vmul.f32 %v451_v54, %v1394_v18 }
 0xa36   :  { %v458_v59 = vsel %vm70_vm1, %v457_v57, 0.0  ;;  %v453_v60 = vsel %vm70_vm1, %v452_v58, 0.0 }
 0xa37   :  { %459 = vadd.xlane.f32.xlu0 %v458_v59  ;;  %454 = vadd.xlane.f32.xlu1 %v453_v60 }
 0xac4   :  { %v460_v61 = vpop.xlane.xlu0 %459  ;;  %v455_v9 = vpop.xlane.xlu1 %454 }
 0xac5   :  { %v1551_v62 = vadd.f32 %v460_v61, %v1407_v25  ;;  %v1556_v11 = vadd.f32 %v455_v9, %v1407_v25 }
 0xac7   :  { %v462_v4 = vmul.f32 1.442695, %v1551_v62  ;;  %v464_v12 = vmul.f32 0.5, %v1556_v11 }
 0xac9   :  { %1257 = vpow2.f32 %v462_v4 }
 0xaca   :  { %1259 = vtanh.f32 %v464_v12 }
 0xad3   :  { %v1258_v6 = vpop.eup %1257 }
 0xad4   :  { %470 = vrot.lane.b32.xlu0 %v1258_v6, %s1301_s18  ;;  %v1260_v21 = vpop.eup %1259 }
 0xad5   :  { %v466_v23 = vadd.f32 1.0, %v1260_v21 }
 0xad7   :  { %v467_v26 = vmul.f32 0.5, %v466_v23 }
 0xad8   :  { %497 = vperm.xlu0 %1193, %v1556_v11  }
 0xad9   :  { %v468_v29 = vmul.f32 100.0, %v467_v26 }
 0xadc   :  { %1197 = vset.pattern.permute.xlu0 %v1309_v38 }
 0xb46   :  { %v471_v15 = vpop.permute.xlu0 %470 }
 0xb47   :  { %v473_v17 = vmul.f32 %v1419_v39, %v471_v15 }
 0xb49   :  { %v474_v19 = vadd.f32 1.0, %v473_v17 }
 0xb4b   :  { %1261 = vrcp.f32 %v474_v19 }
 0xb55   :  { %v1262_v27 = vpop.eup %1261 }
 0xb56   :  { %v476_v5 = vmul.f32 100.0, %v1262_v27 }
 0xb57   :  { %v498_v52 = vpop.permute.xlu0 %497 }
 0xb58   :  { %v477_v7 = vsub.f32 %v476_v5, %v468_v29  ;;  %v500_v54 = vmul.f32 %v498_v52, %v1439_v13 }
 0xb5a   :  { %v478_v30 = vmul.f32 %v477_v7, %v1422_v50 }
 0xb5c   :  { %v479_v32 = vmul.f32 0.1009131, %v478_v30 }
 0xb5e   :  { %v480_v35 = vmul.f32 %v479_v32, %v478_v30 }
 0xb60   :  { %v481_v37 = vadd.f32 1.1283792, %v480_v35 }
 0xb62   :  { %v482_v28 = vmul.f32 %v481_v37, %v478_v30 }
 0xb64   :  { %1263 = vtanh.f32 %v482_v28 }
 0xb6e   :  { %v1264_v40 = vpop.eup %1263 }
 0xb6f   :  { %v484_v41 = vmul.f32 0.5, %v1264_v40 }
 0xb71   :  { %v485_v43 = vadd.f32 0.5, %v484_v41 }
 0xb73   :  { %v486_v44 = vmul.f32 0.98, %v485_v43 }
 0xb75   :  { %v487_v45 = vadd.f32 0.01, %v486_v44 }
 0xb77   :  { %489 = vrot.lane.b32.xlu1 %v487_v45, %s1310_s22 }
 0xb7b   :  { %503 = vperm.xlu1 %1196, %v1551_v62  }
 0xb7f   :  { %1198 = vset.pattern.permute.xlu1 %v1300_v2 }
 0xbe9   :  { %v490_v48 = vpop.permute.xlu1 %489 }
 0xbea   :  { %vm492_vm6 = vcmp.lt.f32.partialorder %v1404_v24, %v490_v48 }
 0xbeb   :  { %v1566_v49 = vsel %vm492_vm6, 1.0, %v1298_v0  ;;  %vm1007_vm6 = vcmask 105472  }
 0xbec   :  { %510 = vperm.xlu0 %1197, %v1566_v49  }
 0xbfa   :  { %v504_v34 = vpop.permute.xlu1 %503 }
 0xbfb   :  { %v506_v53 = vmul.f32 %v504_v34, %v1435_v10 }
 0xbfd   :  { %v507_v57 = vadd.f32 %v506_v53, %v500_v54 }
 0xc6b   :  { %v511_v56 = vpop.permute.xlu0 %510 }
 0xc6c   :  { %v513_v58 = vmul.f32 %v511_v56, %v1443_v16 }
 0xc6e   :  { %v514_v59 = vadd.f32 %v513_v58, %v507_v57 }
 0xc70   :  { %v515_v60 = vadd.f32 %v514_v59, %v1448_v22  ;;  %v1311_v59 = vmov 6  }
 0xc71   :  { %1200 = vset.pattern.permute.xlu0 %v1311_v59 }
 0xc72   :  { %v516_v61 = vmax.f32 %v515_v60, 0.0 }
 0xc74   :  { %v1574_v4 = vadd.f32 %v516_v61, %v1534_v47 }
 0xc76   :  { %v518_v6 = vpack.c.bf16 %v1574_v4, %v1574_v4 }
 0xc78   :  { %1135 = vmatmul.mubr.msk.bf16.vlgmr.msra.gmra.mrb[8].mxu0 %vm70_vm1, %v518_v6 }
 0xc79   :  { %1147 = vmatpush3.bf16.msra.mxu0 %v1347_v1  ;;  %1150 = vmatprep.mubr.msk.bf16.mxu0 %vm1299_vm0, %v1298_v0 }
 0xc7a   :  { %1148 = vmatprep.subr.bf16.mxu0 %v1298_v0 }
 0xc7d   :  { %1149 = vmatpush3.bf16.msra.mxu0 %v1357_v3 }
 0xd4b   :  { %v556_v9 = vpop.f32.mrb[8].mxu0 }
 0xd4c   :  { %v557_v12 = vadd.f32 %v556_v9, %v1385_v8  ;;  %v1136_v15 = vpop.f32.mrb[9].mxu0 }
 0xd4d   :  { %v559_v47 = vpop.f32.mrb[10].mxu0 }
 0xd4e   :  { %v562_v17 = vmax.f32 %v557_v12, 0.0  ;;  %v1137_v19 = vpop.f32.mrb[11].mxu0 }
 0xd50   :  { %v568_v21 = vmul.f32 %v562_v17, %v1391_v14  ;;  %v563_v23 = vmul.f32 %v562_v17, %v1394_v18 }
 0xd52   :  { %v569_v26 = vsel %vm70_vm1, %v568_v21, 0.0  ;;  %v564_v27 = vsel %vm70_vm1, %v563_v23, 0.0 }
 0xd53   :  { %570 = vadd.xlane.f32.xlu1 %v569_v26  ;;  %565 = vadd.xlane.f32.xlu0 %v564_v27 }
 0xde0   :  { %v571_v29 = vpop.xlane.xlu1 %570  ;;  %v566_v32 = vpop.xlane.xlu0 %565 }
 0xde1   :  { %v1590_v5 = vadd.f32 %v571_v29, %v1407_v25  ;;  %v1595_v35 = vadd.f32 %v566_v32, %v1407_v25 }
 0xde3   :  { %v573_v7 = vmul.f32 1.442695, %v1590_v5  ;;  %v575_v37 = vmul.f32 0.5, %v1595_v35 }
 0xde5   :  { %1265 = vpow2.f32 %v573_v7 }
 0xde6   :  { %1267 = vtanh.f32 %v575_v37 }
 0xdef   :  { %v1266_v30 = vpop.eup %1265 }
 0xdf0   :  { %581 = vrot.lane.b32.xlu1 %v1266_v30, %s1301_s18  ;;  %v1268_v41 = vpop.eup %1267 }
 0xdf1   :  { %v577_v43 = vadd.f32 1.0, %v1268_v41 }
 0xdf3   :  { %v578_v44 = vmul.f32 0.5, %v577_v43 }
 0xdf4   :  { %608 = vperm.xlu1 %1198, %v1595_v35  }
 0xdf5   :  { %v579_v48 = vmul.f32 100.0, %v578_v44 }
 0xdf8   :  { %1199 = vset.pattern.permute.xlu1 %v1302_v36 }
 0xdf9   :  { %614 = vperm.xlu1 %1199, %v1590_v5  }
 0xdfd   :  { %1201 = vset.pattern.permute.xlu1 %v1300_v2 }
 0xe62   :  { %v582_v28 = vpop.permute.xlu1 %581 }
 0xe63   :  { %v584_v38 = vmul.f32 %v1419_v39, %v582_v28 }
 0xe65   :  { %v585_v40 = vadd.f32 1.0, %v584_v38 }
 0xe67   :  { %1269 = vrcp.f32 %v585_v40 }
 0xe71   :  { %v1270_v45 = vpop.eup %1269 }
 0xe72   :  { %v587_v34 = vmul.f32 100.0, %v1270_v45 }
 0xe73   :  { %v609_v17 = vpop.permute.xlu1 %608 }
 0xe74   :  { %v588_v52 = vsub.f32 %v587_v34, %v579_v48  ;;  %v611_v23 = vmul.f32 %v609_v17, %v1439_v13 }
 0xe76   :  { %v589_v53 = vmul.f32 %v588_v52, %v1422_v50 }
 0xe78   :  { %v590_v54 = vmul.f32 0.1009131, %v589_v53  ;;  %v615_v19 = vpop.permute.xlu1 %614 }
 0xe79   :  { %v617_v21 = vmul.f32 %v615_v19, %v1435_v10 }
 0xe7a   :  { %v591_v56 = vmul.f32 %v590_v54, %v589_v53 }
 0xe7b   :  { %v618_v27 = vadd.f32 %v617_v21, %v611_v23 }
 0xe7c   :  { %v592_v57 = vadd.f32 1.1283792, %v591_v56 }
 0xe7e   :  { %v593_v58 = vmul.f32 %v592_v57, %v589_v53 }
 0xe80   :  { %1271 = vtanh.f32 %v593_v58 }
 0xe8a   :  { %v1272_v60 = vpop.eup %1271 }
 0xe8b   :  { %v595_v61 = vmul.f32 0.5, %v1272_v60 }
 0xe8d   :  { %v596_v6 = vadd.f32 0.5, %v595_v61 }
 0xe8f   :  { %v597_v9 = vmul.f32 0.98, %v596_v6 }
 0xe91   :  { %v598_v12 = vadd.f32 0.01, %v597_v9 }
 0xe93   :  { %600 = vrot.lane.b32.xlu0 %v598_v12, %s1312_s23 }
 0xf05   :  { %v601_v15 = vpop.permute.xlu0 %600 }
 0xf06   :  { %vm603_vm7 = vcmp.lt.f32.partialorder %v1404_v24, %v601_v15 }
 0xf07   :  { %v1607_v47 = vsel %vm603_vm7, 1.0, %v1298_v0  ;;  %vm1009_vm7 = vcmask 113664  }
 0xf08   :  { %621 = vperm.xlu0 %1200, %v1607_v47  }
 0xf87   :  { %v622_v26 = vpop.permute.xlu0 %621 }
 0xf88   :  { %v624_v29 = vmul.f32 %v622_v26, %v1443_v16 }
 0xf8a   :  { %v625_v7 = vadd.f32 %v624_v29, %v618_v27 }
 0xf8c   :  { %v626_v30 = vadd.f32 %v625_v7, %v1448_v22  ;;  %v1313_v7 = vmov 7  }
 0xf8d   :  { %1203 = vset.pattern.permute.xlu0 %v1313_v7 }
 0xf8e   :  { %v627_v32 = vmax.f32 %v626_v30, 0.0 }
 0xf90   :  { %v1615_v37 = vadd.f32 %v627_v32, %v1574_v4 }
 0xf92   :  { %v629_v28 = vpack.c.bf16 %v1615_v37, %v1615_v37 }
 0xf94   :  { %1143 = vmatmul.mubr.msk.bf16.vlgmr.msra.gmra.mrb[8].mxu1 %vm70_vm1, %v629_v28 }
 0xf95   :  { %1155 = vmatpush3.bf16.msra.mxu1 %v1347_v1  ;;  %1158 = vmatprep.mubr.msk.bf16.mxu1 %vm1299_vm0, %v1298_v0  ;;  %vm995_vm0 = vcmask 56320  }
 0xf96   :  { %1156 = vmatprep.subr.bf16.mxu1 %v1298_v0 }
 0xf99   :  { %1157 = vmatpush3.bf16.msra.mxu1 %v1357_v3 }
0x1067   :  { %v667_v38 = vpop.f32.mrb[8].mxu1 }
0x1068   :  { %v668_v40 = vadd.f32 %v667_v38, %v1385_v8  ;;  %v1144_v41 = vpop.f32.mrb[9].mxu1 }
0x1069   :  { %v670_v4 = vpop.f32.mrb[10].mxu1 }
0x106a   :  { %v673_v43 = vmax.f32 %v668_v40, 0.0  ;;  %v1145_v44 = vpop.f32.mrb[11].mxu1 }
0x106c   :  { %v679_v45 = vmul.f32 %v673_v43, %v1391_v14  ;;  %v674_v48 = vmul.f32 %v673_v43, %v1394_v18 }
0x106e   :  { %v680_v1 = vsel %vm70_vm1, %v679_v45, 0.0  ;;  %v675_v34 = vsel %vm70_vm1, %v674_v48, 0.0 }
0x106f   :  { %681 = vadd.xlane.f32.xlu1 %v680_v1  ;;  %676 = vadd.xlane.f32.xlu0 %v675_v34 }
0x10fc   :  { %v682_v52 = vpop.xlane.xlu1 %681  ;;  %v677_v56 = vpop.xlane.xlu0 %676 }
0x10fd   :  { %v1631_v3 = vadd.f32 %v682_v52, %v1407_v25  ;;  %v1636_v57 = vadd.f32 %v677_v56, %v1407_v25 }
0x10ff   :  { %v684_v53 = vmul.f32 1.442695, %v1631_v3  ;;  %v686_v58 = vmul.f32 0.5, %v1636_v57 }
0x1101   :  { %1273 = vpow2.f32 %v684_v53 }
0x1102   :  { %1275 = vtanh.f32 %v686_v58 }
0x110b   :  { %v1274_v54 = vpop.eup %1273 }
0x110c   :  { %692 = vrot.lane.b32.xlu1 %v1274_v54, %s1301_s18  ;;  %v1276_v6 = vpop.eup %1275 }
0x110d   :  { %v688_v9 = vadd.f32 1.0, %v1276_v6 }
0x110f   :  { %v689_v12 = vmul.f32 0.5, %v688_v9 }
0x1110   :  { %719 = vperm.xlu1 %1201, %v1636_v57  }
0x1111   :  { %v690_v17 = vmul.f32 100.0, %v689_v12 }
0x1114   :  { %1202 = vset.pattern.permute.xlu1 %v1302_v36 }
0x1115   :  { %725 = vperm.xlu1 %1202, %v1631_v3  }
0x1119   :  { %1204 = vset.pattern.permute.xlu1 %v1300_v2 }
0x117e   :  { %v693_v59 = vpop.permute.xlu1 %692 }
0x117f   :  { %v695_v60 = vmul.f32 %v1419_v39, %v693_v59 }
0x1181   :  { %v696_v61 = vadd.f32 1.0, %v695_v60 }
0x1183   :  { %1277 = vrcp.f32 %v696_v61 }
0x118d   :  { %v1278_v15 = vpop.eup %1277 }
0x118e   :  { %v698_v19 = vmul.f32 100.0, %v1278_v15 }
0x118f   :  { %v720_v43 = vpop.permute.xlu1 %719 }
0x1190   :  { %v699_v21 = vsub.f32 %v698_v19, %v690_v17  ;;  %v722_v48 = vmul.f32 %v720_v43, %v1439_v13 }
0x1192   :  { %v700_v23 = vmul.f32 %v699_v21, %v1422_v50 }
0x1194   :  { %v701_v26 = vmul.f32 0.1009131, %v700_v23  ;;  %v726_v44 = vpop.permute.xlu1 %725 }
0x1195   :  { %v728_v45 = vmul.f32 %v726_v44, %v1435_v10 }
0x1196   :  { %v702_v27 = vmul.f32 %v701_v26, %v700_v23 }
0x1197   :  { %v729_v34 = vadd.f32 %v728_v45, %v722_v48 }
0x1198   :  { %v703_v2 = vadd.f32 1.1283792, %v702_v27 }
0x119a   :  { %v704_v29 = vmul.f32 %v703_v2, %v700_v23 }
0x119c   :  { %1279 = vtanh.f32 %v704_v29 }
0x11a6   :  { %v1280_v30 = vpop.eup %1279 }
0x11a7   :  { %v706_v32 = vmul.f32 0.5, %v1280_v30 }
0x11a9   :  { %v707_v28 = vadd.f32 0.5, %v706_v32 }
0x11ab   :  { %v708_v38 = vmul.f32 0.98, %v707_v28 }
0x11ad   :  { %v709_v40 = vadd.f32 0.01, %v708_v38 }
0x11af   :  { %711 = vrot.lane.b32.xlu0 %v709_v40, %s1314_s24 }
0x1221   :  { %v712_v41 = vpop.permute.xlu0 %711 }
0x1222   :  { %vm714_vm8 = vcmp.lt.f32.partialorder %v1404_v24, %v712_v41 }
0x1223   :  { %v1647_v4 = vsel %vm714_vm8, 1.0, %v1298_v0  ;;  %vm1011_vm8 = vcmask 121856  }
0x1224   :  { %732 = vperm.xlu0 %1203, %v1647_v4  }
0x12a3   :  { %v733_v1 = vpop.permute.xlu0 %732 }
0x12a4   :  { %v735_v52 = vmul.f32 %v733_v1, %v1443_v16 }
0x12a6   :  { %v736_v53 = vadd.f32 %v735_v52, %v729_v34 }
0x12a8   :  { %v737_v54 = vadd.f32 %v736_v53, %v1448_v22 }
0x12aa   :  { %v738_v56 = vmax.f32 %v737_v54, 0.0 }
0x12ac   :  { %v1655_v58 = vadd.f32 %v738_v56, %v1615_v37  ;;  %v1315_v56 = vmov 8  }
0x12ad   :  { %1206 = vset.pattern.permute.xlu0 %v1315_v56 }
0x12ae   :  { %v740_v59 = vpack.c.bf16 %v1655_v58, %v1655_v58 }
0x12b0   :  { %1151 = vmatmul.mubr.msk.bf16.vlgmr.msra.gmra.mrb[12].mxu0 %vm70_vm1, %v740_v59 }
0x1383   :  { %v778_v60 = vpop.f32.mrb[12].mxu0 }
0x1384   :  { %v779_v61 = vadd.f32 %v778_v60, %v1385_v8  ;;  %v1152_v6 = vpop.f32.mrb[13].mxu0 }
0x1385   :  { %v781_v9 = vpop.f32.mrb[14].mxu0 }
0x1386   :  { %v784_v12 = vmax.f32 %v779_v61, 0.0  ;;  %v1153_v15 = vpop.f32.mrb[15].mxu0 }
0x1388   :  { %v790_v17 = vmul.f32 %v784_v12, %v1391_v14  ;;  %v785_v19 = vmul.f32 %v784_v12, %v1394_v18 }
0x138a   :  { %v791_v21 = vsel %vm70_vm1, %v790_v17, 0.0  ;;  %v786_v37 = vsel %vm70_vm1, %v785_v19, 0.0 }
0x138b   :  { %792 = vadd.xlane.f32.xlu1 %v791_v21  ;;  %787 = vadd.xlane.f32.xlu0 %v786_v37 }
0x1418   :  { %v793_v23 = vpop.xlane.xlu1 %792  ;;  %v788_v29 = vpop.xlane.xlu0 %787 }
0x1419   :  { %v1666_v26 = vadd.f32 %v793_v23, %v1407_v25  ;;  %v1671_v7 = vadd.f32 %v788_v29, %v1407_v25 }
0x141b   :  { %v795_v27 = vmul.f32 1.442695, %v1666_v26  ;;  %v797_v30 = vmul.f32 0.5, %v1671_v7 }
0x141d   :  { %1281 = vpow2.f32 %v795_v27 }
0x141e   :  { %1283 = vtanh.f32 %v797_v30 }
0x1427   :  { %v1282_v2 = vpop.eup %1281 }
0x1428   :  { %803 = vrot.lane.b32.xlu1 %v1282_v2, %s1301_s18  ;;  %v1284_v40 = vpop.eup %1283 }
0x1429   :  { %v799_v41 = vadd.f32 1.0, %v1284_v40 }
0x142b   :  { %v800_v43 = vmul.f32 0.5, %v799_v41 }
0x142c   :  { %830 = vperm.xlu1 %1204, %v1671_v7  }
0x142d   :  { %v801_v45 = vmul.f32 100.0, %v800_v43 }
0x1430   :  { %1205 = vset.pattern.permute.xlu1 %v1302_v36 }
0x1431   :  { %836 = vperm.xlu1 %1205, %v1666_v26  }
0x149a   :  { %v804_v32 = vpop.permute.xlu1 %803 }
0x149b   :  { %v806_v28 = vmul.f32 %v1419_v39, %v804_v32 }
0x149d   :  { %v807_v38 = vadd.f32 1.0, %v806_v28 }
0x149f   :  { %1285 = vrcp.f32 %v807_v38 }
0x14a9   :  { %v1286_v44 = vpop.eup %1285 }
0x14aa   :  { %v809_v48 = vmul.f32 100.0, %v1286_v44 }
0x14ab   :  { %v831_v17 = vpop.permute.xlu1 %830 }
0x14ac   :  { %v810_v1 = vsub.f32 %v809_v48, %v801_v45  ;;  %v833_v37 = vmul.f32 %v831_v17, %v1439_v13 }
0x14ae   :  { %v811_v34 = vmul.f32 %v810_v1, %v1422_v50 }
0x14b0   :  { %v812_v36 = vmul.f32 0.1009131, %v811_v34  ;;  %v837_v19 = vpop.permute.xlu1 %836 }
0x14b1   :  { %v839_v21 = vmul.f32 %v837_v19, %v1435_v10 }
0x14b2   :  { %v813_v52 = vmul.f32 %v812_v36, %v811_v34 }
0x14b3   :  { %v840_v27 = vadd.f32 %v839_v21, %v833_v37 }
0x14b4   :  { %v814_v53 = vadd.f32 1.1283792, %v813_v52 }
0x14b6   :  { %v815_v54 = vmul.f32 %v814_v53, %v811_v34  ;;  %v1207_v34 = vpack.i.bf16 %v1484_v20, %v1428_v63 }
0x14b8   :  { %1287 = vtanh.f32 %v815_v54 }
0x14c2   :  { %v1288_v59 = vpop.eup %1287 }
0x14c3   :  { %v817_v60 = vmul.f32 0.5, %v1288_v59 }
0x14c5   :  { %v818_v61 = vadd.f32 0.5, %v817_v60 }
0x14c7   :  { %v819_v6 = vmul.f32 0.98, %v818_v61 }
0x14c9   :  { %v820_v9 = vadd.f32 0.01, %v819_v6 }
0x14cb   :  { %822 = vrot.lane.b32.xlu0 %v820_v9, %s1316_s25 }
0x153d   :  { %v823_v12 = vpop.permute.xlu0 %822 }
0x153e   :  { %vm825_vm9 = vcmp.lt.f32.partialorder %v1404_v24, %v823_v12 }
0x153f   :  { %v1682_v15 = vsel %vm825_vm9, 1.0, %v1298_v0  ;;  %vm1050_vm9 = vcmask 130048  }
0x1540   :  { %843 = vperm.xlu0 %1206, %v1682_v15  }
0x15bf   :  { %v844_v23 = vpop.permute.xlu0 %843 }
0x15c0   :  { %v846_v2 = vmul.f32 %v844_v23, %v1443_v16 }
0x15c2   :  { %v847_v29 = vadd.f32 %v846_v2, %v840_v27  ;;  %v1217_v27 = vpack.i.bf16 %v1647_v4, %v1607_v47 }
0x15c4   :  { %v848_v30 = vadd.f32 %v847_v29, %v1448_v22 }
0x15c6   :  { %v849_v32 = vmax.f32 %v848_v30, 0.0 }
0x15c8   :  { %v850_v24 = vadd.f32 %v849_v32, %v1655_v58 }
0x15ca   :  { %v851_v28 = vpack.c.bf16 %v850_v24, %v850_v24 }
0x15cc   :  { %1159 = vmatmul.mubr.msk.bf16.vlgmr.msra.gmra.mrb[12].mxu1 %vm70_vm1, %v851_v28 }
0x169f   :  { %v889_v38 = vpop.f32.mrb[12].mxu1 }
0x16a0   :  { %v890_v40 = vadd.f32 %v889_v38, %v1385_v8  ;;  %v1160_v41 = vpop.f32.mrb[13].mxu1 }
0x16a1   :  { %v892_v10 = vpop.f32.mrb[14].mxu1 }
0x16a2   :  { %v895_v43 = vmax.f32 %v890_v40, 0.0  ;;  %v1161_v13 = vpop.f32.mrb[15].mxu1 }
0x16a4   :  { %v901_v44 = vmul.f32 %v895_v43, %v1391_v14  ;;  %v896_v16 = vmul.f32 %v895_v43, %v1394_v18  ;;  %v1212_v14 = vpack.i.bf16 %v1566_v49, %v1525_v31 }
0x16a6   :  { %v902_v45 = vsel %vm70_vm1, %v901_v44, 0.0  ;;  %v897_v22 = vsel %vm70_vm1, %v896_v16, 0.0  ;;  %vm997_vm1 = vcmask 64512  }
0x16a7   :  { %903 = vadd.xlane.f32.xlu1 %v902_v45  ;;  %898 = vadd.xlane.f32.xlu0 %v897_v22 }
0x1734   :  { %v904_v58 = vpop.xlane.xlu1 %903  ;;  %v899_v18 = vpop.xlane.xlu0 %898 }
0x1735   :  { %v905_v48 = vadd.f32 %v904_v58, %v1407_v25  ;;  %v900_v36 = vadd.f32 %v899_v18, %v1407_v25 }
0x1737   :  { %v906_v1 = vmul.f32 1.442695, %v905_v48  ;;  %v908_v52 = vmul.f32 0.5, %v900_v36 }
0x1739   :  { %1289 = vpow2.f32 %v906_v1 }
0x173a   :  { %1291 = vtanh.f32 %v908_v52 }
0x1743   :  { %v1290_v8 = vpop.eup %1289 }
0x1744   :  { %914 = vrot.lane.b32.xlu1 %v1290_v8, %s1301_s18  ;;  %v1292_v59 = vpop.eup %1291 }
0x1745   :  { %v910_v63 = vadd.f32 1.0, %v1292_v59 }
0x1747   :  { %v911_v20 = vmul.f32 0.5, %v910_v63 }
0x1748   :  { %1208 = vrot.lane.b32.xlu1 %v1207_v34, %s1317_s26 }
0x1749   :  { %v912_v61 = vmul.f32 100.0, %v911_v20 }
0x174c   :  { %1213 = vrot.lane.b32.xlu1 %v1212_v14, %s1317_s26 }
0x17b6   :  { %v915_v53 = vpop.permute.xlu1 %914 }
0x17b7   :  { %v917_v54 = vmul.f32 %v1419_v39, %v915_v53 }
0x17b9   :  { %v918_v56 = vadd.f32 1.0, %v917_v54 }
0x17bb   :  { %1293 = vrcp.f32 %v918_v56 }
0x17c5   :  { %v1294_v60 = vpop.eup %1293 }
0x17c6   :  { %v920_v6 = vmul.f32 100.0, %v1294_v60 }
0x17c8   :  { %v921_v9 = vsub.f32 %v920_v6, %v912_v61 }
0x17ca   :  { %v922_v31 = vmul.f32 %v921_v9, %v1422_v50 }
0x17cc   :  { %v923_v49 = vmul.f32 0.1009131, %v922_v31 }
0x17ce   :  { %v924_v12 = vmul.f32 %v923_v49, %v922_v31 }
0x17d0   :  { %v925_v17 = vadd.f32 1.1283792, %v924_v12 }
0x17d2   :  { %v926_v25 = vmul.f32 %v925_v17, %v922_v31 }
0x17d4   :  { %1295 = vtanh.f32 %v926_v25 }
0x17de   :  { %v1296_v19 = vpop.eup %1295 }
0x17df   :  { %v928_v21 = vmul.f32 0.5, %v1296_v19 }
0x17e1   :  { %v929_v37 = vadd.f32 0.5, %v928_v21 }
0x17e3   :  { %v930_v39 = vmul.f32 0.98, %v929_v37 }
0x17e5   :  { %v931_v23 = vadd.f32 0.01, %v930_v39 }
0x17e7   :  { %933 = vrot.lane.b32.xlu0 %v931_v23, %s1318_s27 }
0x17eb   :  { %1218 = vrot.lane.b32.xlu0 %v1217_v27, %s1317_s26 }
0x17ef   :  { %939 = vrot.lane.b32.xlu0 %v1474_v46, %s1304_s19  ;;  %v1297_v46 = vld [vmem:[%s1757_s0] sm:$0xff]  ;;  %s1322_s0 = smov 16  }
0x17f3   :  { %945 = vrot.lane.b32.xlu0 %v1515_v55, %s1307_s21 }
0x17f7   :  { %951 = vrot.lane.b32.xlu0 %v1556_v11, %s1312_s23 }
0x17fb   :  { %957 = vrot.lane.b32.xlu0 %v1595_v35, %s1316_s25 }
0x17ff   :  { %963 = vrot.lane.b32.xlu0 %v1636_v57, %s1319_s28 }
0x1803   :  { %969 = vrot.lane.b32.xlu0 %v1671_v7, %s1320_s29 }
0x1807   :  { %976 = vrot.lane.b32.xlu0 %v900_v36, %s1321_s30 }
0x1859   :  { %v934_v50 = vpop.permute.xlu0 %933 }
0x185a   :  { %vm936_vm10 = vcmp.lt.f32.partialorder %v1297_v46, %v934_v50 }
0x185b   :  { %v1073_v55 = vsel %vm936_vm10, 1.0, %v1298_v0  ;;  %v1209_v0 = vpop.permute.xlu1 %1208 }
0x185c   :  { %v1222_v11 = vpack.i.bf16 %v1073_v55, %v1682_v15  ;;  %v1211_v57 = vunpack.i.h.bf16 %v1209_v0  ;;  %v1210_v4 = vunpack.i.l.bf16 %v1209_v0 }
0x185d   :  { %v1219_v47 = vpop.permute.xlu0 %1218 }
0x185e   :  { %1223 = vrot.lane.b32.xlu1 %v1222_v11, %s1317_s26  ;;  %v1220_v15 = vunpack.i.l.bf16 %v1219_v47 }
0x185f   :  { %v1214_v35 = vpop.permute.xlu1 %1213 }
0x1860   :  { %v1216_v7 = vunpack.i.h.bf16 %v1214_v35 }
0x1861   :  { %v940_v2 = vpop.permute.xlu0 %939 }
0x1862   :  { %942 = vrot.lane.b32.xlu1 %v1469_v42, %s1304_s19  ;;  %v1215_v42 = vunpack.i.l.bf16 %v1214_v35  ;;  %v986_v40 = vsel %vm985_vm11, %v1413_v33, %v940_v2 }
0x1865   :  { %v946_v30 = vpop.permute.xlu0 %945 }
0x1866   :  { %948 = vrot.lane.b32.xlu1 %v1510_v51, %s1307_s21  ;;  %v1038_v51 = vsel %vm983_vm2, %v1210_v4, %v1211_v57  ;;  %vm999_vm2 = vcmask 72704  }
0x1869   :  { %v952_v44 = vpop.permute.xlu0 %951 }
0x186a   :  { %954 = vrot.lane.b32.xlu1 %v1551_v62, %s1312_s23  ;;  %v1039_v62 = vsel %vm985_vm11, %v1038_v51, %v1215_v42 }
0x186d   :  { %v958_v1 = vpop.permute.xlu0 %957 }
0x186e   :  { %960 = vrot.lane.b32.xlu1 %v1590_v5, %s1316_s25  ;;  %v1221_v5 = vunpack.i.h.bf16 %v1219_v47 }
0x1871   :  { %v964_v14 = vpop.permute.xlu0 %963 }
0x1872   :  { %966 = vrot.lane.b32.xlu1 %v1631_v3, %s1319_s28  ;;  %v1040_v3 = vsel %vm987_vm12, %v1039_v62, %v1216_v7 }
0x1875   :  { %v970_v52 = vpop.permute.xlu0 %969 }
0x1876   :  { %972 = vrot.lane.b32.xlu1 %v1666_v26, %s1320_s29  ;;  %v1041_v26 = vsel %vm989_vm13, %v1040_v3, %v1220_v15 }
0x1877   :  { %v1042_v28 = vsel %vm991_vm14, %v1041_v26, %v1221_v5 }
0x1879   :  { %v977_v63 = vpop.permute.xlu0 %976 }
0x187a   :  { %980 = vrot.lane.b32.xlu1 %v905_v48, %s1321_s30 }
0x18d0   :  { %v1224_v29 = vpop.permute.xlu1 %1223 }
0x18d1   :  { %v1226_v32 = vunpack.i.h.bf16 %v1224_v29  ;;  %v1225_v24 = vunpack.i.l.bf16 %v1224_v29 }
0x18d3   :  { %v1043_v38 = vsel %vm993_vm15, %v1042_v28, %v1225_v24 }
0x18d4   :  { %v943_v41 = vpop.permute.xlu1 %942  ;;  %v1044_v10 = vsel %vm995_vm0, %v1043_v38, %v1226_v32 }
0x18d5   :  { %v988_v43 = vsel %vm987_vm12, %v986_v40, %v943_v41  ;;  %v1045_v13 = vsel %vm997_vm1, %v1044_v10, 0.0 }
0x18d6   :  { %1047 = vrot.lane.b32.xlu0 %v1045_v13, %s1322_s0  ;;  %v990_v45 = vsel %vm989_vm13, %v988_v43, %v946_v30 }
0x18d8   :  { %v949_v16 = vpop.permute.xlu1 %948 }
0x18d9   :  { %v992_v22 = vsel %vm991_vm14, %v990_v45, %v949_v16 }
0x18da   :  { %v994_v58 = vsel %vm993_vm15, %v992_v22, %v952_v44 }
0x18dc   :  { %v955_v48 = vpop.permute.xlu1 %954 }
0x18dd   :  { %v996_v33 = vsel %vm995_vm0, %v994_v58, %v955_v48 }
0x18de   :  { %v998_v8 = vsel %vm997_vm1, %v996_v33, %v958_v1 }
0x18e0   :  { %v961_v34 = vpop.permute.xlu1 %960 }
0x18e1   :  { %v1000_v36 = vsel %vm999_vm2, %v998_v8, %v961_v34 }
0x18e2   :  { %v1002_v53 = vsel %vm1001_vm3, %v1000_v36, %v964_v14 }
0x18e4   :  { %v967_v18 = vpop.permute.xlu1 %966 }
0x18e5   :  { %v1004_v56 = vsel %vm1003_vm4, %v1002_v53, %v967_v18 }
0x18e6   :  { %v1006_v59 = vsel %vm1005_vm5, %v1004_v56, %v970_v52 }
0x18e8   :  { %v973_v54 = vpop.permute.xlu1 %972 }
0x18e9   :  { %v1008_v20 = vsel %vm1007_vm6, %v1006_v59, %v973_v54 }
0x18ea   :  { %v1010_v61 = vsel %vm1009_vm7, %v1008_v20, %v977_v63 }
0x18ec   :  { %v981_v60 = vpop.permute.xlu1 %980 }
0x18ed   :  { %v1012_v6 = vsel %vm1011_vm8, %v1010_v61, %v981_v60 }
0x1948   :  { %v1048_v9 = vpop.permute.xlu0 %1047 }
0x1949   :  { %v1051_v31 = vsel %vm1050_vm9, %v1012_v6, %v1048_v9 }
0x194a   :  { %1052 = vst [vmem:[%s1758_s3] sm:$0xff] %v1051_v31 }

</bundles_post_ra>
